<compile_context>
chip_gen: v7x
topology: tpu7x:2x2x1
jax: 0.10.0
libtpu: 0.0.40
codegen_flags: <defaults>
</compile_context>

<pallas_src>
import functools

import jax
import jax.numpy as jnp
import numpy as np
from jax.experimental import pallas as pl
from jax.experimental.pallas import tpu as pltpu


# ---------------------------------------------------------------------------
# Fused ResBlock kernel (one grid step == nb batch samples stacked on lanes)
# ---------------------------------------------------------------------------
def _resblock_kernel(x_ref, wf_ref, bf_ref, w2_ref, b2_ref, g_ref, be_ref,
                     sg_ref, mval_ref, sel_ref, o_ref,
                     *, Wp, cout, cmid_p, nb, has_conv_shortcut, eps, inv_cnt):
    L = x_ref.shape[2]               # nb * n_pad, multiple of 128 lanes
    n_pad = L // nb                  # per-sample padded-frame length
    hw_pad = o_ref.shape[2] // nb    # per-sample (lane-padded) output length
    shift = Wp + 1                   # frame offset of image pixel (0, 0)

    x = x_ref[0].astype(jnp.float32)                     # (cin_p, L)

    def lane_roll(a, s):
        # circular lane roll, jnp.roll convention, static non-negative amount.
        s = s % a.shape[1]
        return a if s == 0 else pltpu.roll(a, s, axis=1)

    def row_taps(a, dy):
        # (C, L) -> (3C, L): the three dx taps of kernel row dy as XLU rolls.
        # Wrapped-around lanes only ever land in columns the valid-mask /
        # selection matrix discard, so the circular wrap is harmless.
        return jnp.concatenate(
            [lane_roll(a, -(dy * Wp + dx)) for dx in range(3)], axis=0)

    def conv3x3(a, w_ref):
        # dy-chunked accumulation: 3 matmuls of K = 3*Cin instead of one
        # K = 9*Cin matmul over a fully materialized im2col slab.
        acc = None
        for dy in range(3):
            part = jnp.dot(w_ref[dy].astype(jnp.float32), row_taps(a, dy),
                           preferred_element_type=jnp.float32)
            acc = part if acc is None else acc + part
        return acc

    # ---- conv1 (+ shortcut conv rows stacked into the same matmuls) --------
    z = conv3x3(x, wf_ref) + bf_ref[...].astype(jnp.float32)    # (cfirst, L)
    h1 = z[:cout]
    # exact (erf) GELU — matches torch.nn.GELU() default
    g1 = 0.5 * h1 * (1.0 + jax.lax.erf(h1 * jnp.float32(0.7071067811865476)))

    # ---- re-embed conv1 activation into a fresh zero-padded frame ----------
    g1m = g1 * mval_ref[...]                      # zero outside the image
    x2 = lane_roll(g1m, shift)                    # pixel (r,q): r*Wp+q -> (r+1)*Wp+(q+1)
    if cmid_p > cout:                             # sublane-tile channel pad
        x2 = jnp.concatenate(
            [x2, jnp.zeros((cmid_p - cout, L), jnp.float32)], axis=0)

    # ---- conv2 ---------------------------------------------------------------
    h2 = conv3x3(x2, w2_ref) + b2_ref[...].astype(jnp.float32)  # (cout, L)

    # ---- shortcut ------------------------------------------------------------
    if has_conv_shortcut:
        sc = z[cout:]                             # stacked shortcut-conv rows
    else:
        sc = lane_roll(x[:cout], -shift)          # identity, output-aligned
    y = h2 + sc                                   # (cout, L), frame layout

    # ---- crop + stride-select + fused GroupNorm, per stacked sample ---------
    sg = sg_ref[...]                              # (cout, cout) same-group 0/1
    gam = g_ref[...]
    bet = be_ref[...]
    outs = []
    for i in range(nb):
        y_seg = y[:, i * n_pad:(i + 1) * n_pad]
        # Selection matmul (otherwise-idle MXU) = border crop + stride
        # subsample; everything downstream touches only real output pixels.
        yc = jnp.dot(y_seg, sel_ref[...],
                     preferred_element_type=jnp.float32)        # (cout, hw_pad)
        # reduce lanes first (XLU), then one tiny (C,C)x(C,2) group matmul
        rs = jnp.sum(yc, axis=1, keepdims=True)
        rs2 = jnp.sum(yc * yc, axis=1, keepdims=True)
        t = jnp.dot(sg, jnp.concatenate([rs, rs2], axis=1),
                    preferred_element_type=jnp.float32)          # (cout, 2)
        mean = t[:, 0:1] * jnp.float32(inv_cnt)
        # one-pass E[y^2]-E[y]^2; fine at these magnitudes / 2e-3 tolerance
        var = t[:, 1:2] * jnp.float32(inv_cnt) - mean * mean
        outs.append((yc - mean) * jax.lax.rsqrt(var + jnp.float32(eps))
                    * gam + bet)
    out = outs[0] if nb == 1 else jnp.concatenate(outs, axis=1)
    o_ref[0] = out.astype(o_ref.dtype)


# ---------------------------------------------------------------------------
# Wrapper: NCHW in / NCHW out (PyTorch-style); all glue is layout plumbing
# ---------------------------------------------------------------------------
def _round_up(v, m):
    return (v + m - 1) // m * m


def resblock_forward(x_nchw, params, *, in_ch, out_ch, stride=1, eps=1e-5):
    N, _, H, W = x_nchw.shape
    Hp, Wp = H + 2, W + 2
    n_flat = Hp * Wp
    n_pad = _round_up(n_flat, 128)          # lane-dense padded-frame length
    Ho, Wo = (H - 1) // stride + 1, (W - 1) // stride + 1
    hw_out = Ho * Wo
    hw_pad = _round_up(hw_out, 128)         # lane-dense output length
    num_groups = out_ch // 2
    gs = out_ch // num_groups
    cin_p = _round_up(in_ch, 8)             # sublane-tile aligned channel count
    cmid_p = _round_up(out_ch, 8)
    has_conv_sc = not (in_ch == out_ch and stride == 1)
    if not has_conv_sc:
        assert in_ch == out_ch, "identity shortcut requires in_ch == out_ch"

    # samples stacked per grid step (lane batching); keep >= 2 grid steps so
    # both v7x TensorCores get work under dimension_semantics=("parallel",).
    nb = 1
    for cand in (4, 2):
        if N % cand == 0 and N // cand >= 2:
            nb = cand
            break
    nblk = N // nb

    # pad channels + spatial border once, lane-pad each frame, then stack nb
    # samples along the lane axis (layout plumbing, once, in the wrapper).
    xf = jnp.pad(x_nchw, ((0, 0), (0, cin_p - in_ch), (1, 1), (1, 1)))
    xf = xf.reshape(N, cin_p, n_flat)
    xf = jnp.pad(xf, ((0, 0), (0, 0), (0, n_pad - n_flat)))
    xf = xf.reshape(nblk, nb, cin_p, n_pad).transpose(0, 2, 1, 3)
    xf = xf.reshape(nblk, cin_p, nb * n_pad)

    def to_dy_major(w_hwio, cin_pad):
        # HWIO -> (3, Cout, 3*cin_pad): dy-major chunks, (dx, cin) minor, so the
        # kernel's per-dy matmul reads a whole aligned slab via w_ref[dy].
        w = jnp.pad(w_hwio, ((0, 0), (0, 0), (0, cin_pad - w_hwio.shape[2]), (0, 0)))
        w = jnp.transpose(w, (3, 0, 1, 2)).reshape(w_hwio.shape[3], 3, 3 * cin_pad)
        return jnp.transpose(w, (1, 0, 2)).astype(jnp.float32)

    w1_3d = to_dy_major(params["w1"], cin_p)                # (3, out_ch, 3*cin_p)
    if has_conv_sc:
        wf = jnp.concatenate([w1_3d, to_dy_major(params["ws"], cin_p)], axis=1)
        bf = jnp.concatenate([params["b1"], params["bs"]]).reshape(-1, 1)
    else:
        wf, bf = w1_3d, params["b1"].reshape(-1, 1)
    bf = bf.astype(jnp.float32)
    w2_3d = to_dy_major(params["w2"], cmid_p)               # (3, out_ch, 3*cmid_p)
    b2 = params["b2"].reshape(-1, 1).astype(jnp.float32)
    gamma = params["gamma"].reshape(-1, 1).astype(jnp.float32)
    beta = params["beta"].reshape(-1, 1).astype(jnp.float32)

    gid = np.arange(out_ch) // gs
    sg = jnp.asarray(gid[:, None] == gid[None, :], jnp.float32)   # same-group matrix

    jj = np.arange(n_pad)
    r, q = jj // Wp, jj % Wp
    valid = (jj < n_flat) & (r < H) & (q < W)            # real conv-output columns
    mval = jnp.asarray(np.tile(valid.astype(np.float32), nb).reshape(1, nb * n_pad))

    # 0/1 selection matrix: frame column (ho*stride)*Wp + wo*stride -> output
    # slot ho*Wo + wo.  One matmul = border crop + stride subsample.
    sel_np = np.zeros((n_pad, hw_pad), np.float32)
    ho = np.arange(Ho)[:, None]
    wo = np.arange(Wo)[None, :]
    sel_np[(ho * stride * Wp + wo * stride).ravel(),
           (ho * Wo + wo).ravel()] = 1.0
    sel = jnp.asarray(sel_np)

    kern = functools.partial(
        _resblock_kernel, Wp=Wp, cout=out_ch, cmid_p=cmid_p, nb=nb,
        has_conv_shortcut=has_conv_sc, eps=float(eps),
        inv_cnt=1.0 / float(hw_out * gs))

    rep2 = lambda b: (0, 0)
    rep3 = lambda b: (0, 0, 0)
    out_flat = pl.pallas_call(
        kern,
        out_shape=jax.ShapeDtypeStruct((nblk, out_ch, nb * hw_pad), x_nchw.dtype),
        grid_spec=pltpu.PrefetchScalarGridSpec(
            num_scalar_prefetch=0,
            grid=(nblk,),
            in_specs=[
                pl.BlockSpec((1, cin_p, nb * n_pad), lambda b: (b, 0, 0)),
                pl.BlockSpec(wf.shape, rep3),
                pl.BlockSpec(bf.shape, rep2),
                pl.BlockSpec(w2_3d.shape, rep3),
                pl.BlockSpec(b2.shape, rep2),
                pl.BlockSpec(gamma.shape, rep2),
                pl.BlockSpec(beta.shape, rep2),
                pl.BlockSpec(sg.shape, rep2),
                pl.BlockSpec(mval.shape, rep2),
                pl.BlockSpec(sel.shape, rep2),
            ],
            out_specs=pl.BlockSpec((1, out_ch, nb * hw_pad), lambda b: (b, 0, 0)),
        ),
        compiler_params=pltpu.CompilerParams(
            dimension_semantics=("parallel",)),
    )(xf, wf, bf, w2_3d, b2, gamma, beta, sg, mval, sel)

    # un-stack samples / drop the lane padding: pure layout plumbing
    out = out_flat.reshape(nblk, out_ch, nb, hw_pad).transpose(0, 2, 1, 3)
    out = out.reshape(N, out_ch, hw_pad)[:, :, :hw_out]
    return out.reshape(N, out_ch, Ho, Wo)


# ---------------------------------------------------------------------------
# Pure-JAX reference (mirrors the PyTorch module, NCHW / OIHW)
# ---------------------------------------------------------------------------
def resblock_reference(x_nchw, params, *, in_ch, out_ch, stride=1, eps=1e-5):
    def conv(x, w_hwio, b, s):
        w = jnp.transpose(w_hwio, (3, 2, 0, 1))  # HWIO -> OIHW
        y = jax.lax.conv_general_dilated(
            x, w, (s, s), ((1, 1), (1, 1)),
            dimension_numbers=("NCHW", "OIHW", "NCHW"))
        return y + b[None, :, None, None]

    h = conv(x_nchw, params["w1"], params["b1"], 1)
    h = 0.5 * h * (1.0 + jax.lax.erf(h / jnp.sqrt(2.0)))       # exact GELU
    h = conv(h, params["w2"], params["b2"], stride)
    if in_ch == out_ch and stride == 1:
        sc = x_nchw
    else:
        sc = conv(x_nchw, params["ws"], params["bs"], stride)
    y = h + sc

    G = out_ch // 2
    N, C, Ho, Wo = y.shape
    yg = y.reshape(N, G, C // G, Ho, Wo)
    mean = yg.mean(axis=(2, 3, 4), keepdims=True)
    var = ((yg - mean) ** 2).mean(axis=(2, 3, 4), keepdims=True)
    yn = ((yg - mean) / jnp.sqrt(var + eps)).reshape(N, C, Ho, Wo)
    return yn * params["gamma"][None, :, None, None] + params["beta"][None, :, None, None]


if __name__ == "__main__":
    def make_params(key, in_ch, out_ch):
        k1, k2, k3 = jax.random.split(key, 3)
        return {
            "w1": jax.random.normal(k1, (3, 3, in_ch, out_ch), jnp.float32) * 0.1,
            "b1": jnp.linspace(-0.1, 0.1, out_ch, dtype=jnp.float32),
            "w2": jax.random.normal(k2, (3, 3, out_ch, out_ch), jnp.float32) * 0.1,
            "b2": jnp.linspace(0.1, -0.1, out_ch, dtype=jnp.float32),
            "ws": jax.random.normal(k3, (3, 3, in_ch, out_ch), jnp.float32) * 0.1,
            "bs": jnp.linspace(-0.05, 0.05, out_ch, dtype=jnp.float32),
            "gamma": jnp.linspace(0.5, 1.5, out_ch, dtype=jnp.float32),
            "beta": jnp.linspace(-0.2, 0.2, out_ch, dtype=jnp.float32),
        }

    H, W = 16, 16
    # (in_ch, out_ch, stride, batch): N=4 exercises the lane-batched path
    # (2 samples per grid step, 2 grid steps); N=2 exercises the nb=1 path.
    configs = [
        (4, 8, 1, 4),   # conv shortcut (in_ch != out_ch)
        (8, 8, 1, 4),   # identity shortcut
        (4, 8, 2, 4),   # strided conv + conv shortcut
        (4, 8, 1, 2),   # single-sample-per-step fallback
    ]

    key = jax.random.PRNGKey(0)
    for in_ch, out_ch, stride, N in configs:
        key, kx, kp = jax.random.split(key, 3)
        x = jax.random.normal(kx, (N, in_ch, H, W), jnp.float32)
        params = make_params(kp, in_ch, out_ch)

        out = jax.block_until_ready(
            resblock_forward(x, params, in_ch=in_ch, out_ch=out_ch, stride=stride))
        ref = jax.block_until_ready(
            resblock_reference(x, params, in_ch=in_ch, out_ch=out_ch, stride=stride))

        Ho, Wo = (H - 1) // stride + 1, (W - 1) // stride + 1
        assert out.shape == (N, out_ch, Ho, Wo)
        np.testing.assert_allclose(np.asarray(out), np.asarray(ref),
                                   rtol=2e-3, atol=2e-3)

    print("KERNEL_OK")
</pallas_src>

<mosaic_0001>
module attributes {stable_mosaic.version = 11 : i64} {
  func.func @_resblock_kernel(%arg0: i32, %arg1: memref<1x8x768xf32, #tpu.memory_space<vmem>>, %arg2: memref<3x16x24xf32, #tpu.memory_space<vmem>>, %arg3: memref<16x1xf32, #tpu.memory_space<vmem>>, %arg4: memref<3x8x24xf32, #tpu.memory_space<vmem>>, %arg5: memref<8x1xf32, #tpu.memory_space<vmem>>, %arg6: memref<8x1xf32, #tpu.memory_space<vmem>>, %arg7: memref<8x1xf32, #tpu.memory_space<vmem>>, %arg8: memref<8x8xf32, #tpu.memory_space<vmem>>, %arg9: memref<1x768xf32, #tpu.memory_space<vmem>>, %arg10: memref<384x256xf32, #tpu.memory_space<vmem>>, %arg11: memref<1x8x512xf32, #tpu.memory_space<vmem>>) attributes {dimension_semantics = [#tpu.dimension_semantics<parallel>], iteration_bounds = array<i64: 2>, scalar_prefetch = 0 : i64, scratch_operands = 0 : i64, tpu.core_type = #tpu.core_type<tc>, window_params = [{transform_indices = @transform_0, window_bounds = array<i64: 1, 8, 768>}, {pipeline_mode = #tpu.pipeline_mode<synchronous>, transform_indices = @transform_1, window_bounds = array<i64: 3, 16, 24>}, {pipeline_mode = #tpu.pipeline_mode<synchronous>, transform_indices = @transform_2, window_bounds = array<i64: 16, 1>}, {pipeline_mode = #tpu.pipeline_mode<synchronous>, transform_indices = @transform_3, window_bounds = array<i64: 3, 8, 24>}, {pipeline_mode = #tpu.pipeline_mode<synchronous>, transform_indices = @transform_4, window_bounds = array<i64: 8, 1>}, {pipeline_mode = #tpu.pipeline_mode<synchronous>, transform_indices = @transform_5, window_bounds = array<i64: 8, 1>}, {pipeline_mode = #tpu.pipeline_mode<synchronous>, transform_indices = @transform_6, window_bounds = array<i64: 8, 1>}, {pipeline_mode = #tpu.pipeline_mode<synchronous>, transform_indices = @transform_7, window_bounds = array<i64: 8, 8>}, {pipeline_mode = #tpu.pipeline_mode<synchronous>, transform_indices = @transform_8, window_bounds = array<i64: 1, 768>}, {pipeline_mode = #tpu.pipeline_mode<synchronous>, transform_indices = @transform_9, window_bounds = array<i64: 384, 256>}, {transform_indices = @transform_10, window_bounds = array<i64: 1, 8, 512>}]} {
    %c0 = arith.constant 0 : index
    %c0_0 = arith.constant 0 : index
    %c0_1 = arith.constant 0 : index
    %0 = vector.load %arg1[%c0, %c0_0, %c0_1] : memref<1x8x768xf32, #tpu.memory_space<vmem>>, vector<1x8x768xf32>
    %1 = vector.shape_cast %0 : vector<1x8x768xf32> to vector<8x768xf32>
    %c0_2 = arith.constant 0 : index
    %c0_3 = arith.constant 0 : index
    %c0_4 = arith.constant 0 : index
    %2 = vector.load %arg2[%c0_2, %c0_3, %c0_4] : memref<3x16x24xf32, #tpu.memory_space<vmem>>, vector<1x16x24xf32>
    %3 = vector.shape_cast %2 : vector<1x16x24xf32> to vector<16x24xf32>
    %c767_i32 = arith.constant 767 : i32
    %4 = tpu.dynamic_rotate %1 by %c767_i32 dim 1 : vector<8x768xf32>, i32 -> vector<8x768xf32>
    %c766_i32 = arith.constant 766 : i32
    %5 = tpu.dynamic_rotate %1 by %c766_i32 dim 1 : vector<8x768xf32>, i32 -> vector<8x768xf32>
    %6 = tpu.concatenate %1, %4, %5 in 0 : vector<8x768xf32>, vector<8x768xf32>, vector<8x768xf32> -> vector<24x768xf32>
    %cst = arith.constant dense<0.000000e+00> : vector<16x768xf32>
    %7 = tpu.matmul %3, %6, %cst {dimension_numbers = #tpu.dot_dimension_numbers<[1], [0], [0], [1], [0, 0, 1, 1], [], []>} : vector<16x24xf32>, vector<24x768xf32>, vector<16x768xf32> -> vector<16x768xf32>
    %c1 = arith.constant 1 : index
    %c0_5 = arith.constant 0 : index
    %c0_6 = arith.constant 0 : index
    %8 = vector.load %arg2[%c1, %c0_5, %c0_6] : memref<3x16x24xf32, #tpu.memory_space<vmem>>, vector<1x16x24xf32>
    %9 = vector.shape_cast %8 : vector<1x16x24xf32> to vector<16x24xf32>
    %c750_i32 = arith.constant 750 : i32
    %10 = tpu.dynamic_rotate %1 by %c750_i32 dim 1 : vector<8x768xf32>, i32 -> vector<8x768xf32>
    %c749_i32 = arith.constant 749 : i32
    %11 = tpu.dynamic_rotate %1 by %c749_i32 dim 1 : vector<8x768xf32>, i32 -> vector<8x768xf32>
    %c748_i32 = arith.constant 748 : i32
    %12 = tpu.dynamic_rotate %1 by %c748_i32 dim 1 : vector<8x768xf32>, i32 -> vector<8x768xf32>
    %13 = tpu.concatenate %10, %11, %12 in 0 : vector<8x768xf32>, vector<8x768xf32>, vector<8x768xf32> -> vector<24x768xf32>
    %cst_7 = arith.constant dense<0.000000e+00> : vector<16x768xf32>
    %14 = tpu.matmul %9, %13, %cst_7 {dimension_numbers = #tpu.dot_dimension_numbers<[1], [0], [0], [1], [0, 0, 1, 1], [], []>} : vector<16x24xf32>, vector<24x768xf32>, vector<16x768xf32> -> vector<16x768xf32>
    %15 = arith.addf %7, %14 : vector<16x768xf32>
    %c2 = arith.constant 2 : index
    %c0_8 = arith.constant 0 : index
    %c0_9 = arith.constant 0 : index
    %16 = vector.load %arg2[%c2, %c0_8, %c0_9] : memref<3x16x24xf32, #tpu.memory_space<vmem>>, vector<1x16x24xf32>
    %17 = vector.shape_cast %16 : vector<1x16x24xf32> to vector<16x24xf32>
    %c732_i32 = arith.constant 732 : i32
    %18 = tpu.dynamic_rotate %1 by %c732_i32 dim 1 : vector<8x768xf32>, i32 -> vector<8x768xf32>
    %c731_i32 = arith.constant 731 : i32
    %19 = tpu.dynamic_rotate %1 by %c731_i32 dim 1 : vector<8x768xf32>, i32 -> vector<8x768xf32>
    %c730_i32 = arith.constant 730 : i32
    %20 = tpu.dynamic_rotate %1 by %c730_i32 dim 1 : vector<8x768xf32>, i32 -> vector<8x768xf32>
    %21 = tpu.concatenate %18, %19, %20 in 0 : vector<8x768xf32>, vector<8x768xf32>, vector<8x768xf32> -> vector<24x768xf32>
    %cst_10 = arith.constant dense<0.000000e+00> : vector<16x768xf32>
    %22 = tpu.matmul %17, %21, %cst_10 {dimension_numbers = #tpu.dot_dimension_numbers<[1], [0], [0], [1], [0, 0, 1, 1], [], []>} : vector<16x24xf32>, vector<24x768xf32>, vector<16x768xf32> -> vector<16x768xf32>
    %23 = arith.addf %15, %22 : vector<16x768xf32>
    %c0_11 = arith.constant 0 : index
    %c0_12 = arith.constant 0 : index
    %24 = vector.load %arg3[%c0_11, %c0_12] : memref<16x1xf32, #tpu.memory_space<vmem>>, vector<16x1xf32>
    %25 = vector.broadcast %24 : vector<16x1xf32> to vector<16x768xf32>
    %26 = arith.addf %23, %25 : vector<16x768xf32>
    %27 = vector.extract_strided_slice %26 {offsets = [0, 0], sizes = [8, 768], strides = [1, 1]} : vector<16x768xf32> to vector<8x768xf32>
    %cst_13 = arith.constant 5.000000e-01 : f32
    %28 = vector.broadcast %cst_13 : f32 to vector<8x768xf32>
    %29 = arith.mulf %28, %27 : vector<8x768xf32>
    %cst_14 = arith.constant 0.707106769 : f32
    %30 = vector.broadcast %cst_14 : f32 to vector<8x768xf32>
    %31 = arith.mulf %27, %30 : vector<8x768xf32>
    %32 = math.erf %31 : vector<8x768xf32>
    %cst_15 = arith.constant 1.000000e+00 : f32
    %33 = vector.broadcast %cst_15 : f32 to vector<8x768xf32>
    %34 = arith.addf %33, %32 : vector<8x768xf32>
    %35 = arith.mulf %29, %34 : vector<8x768xf32>
    %c0_16 = arith.constant 0 : index
    %c0_17 = arith.constant 0 : index
    %36 = vector.load %arg9[%c0_16, %c0_17] : memref<1x768xf32, #tpu.memory_space<vmem>>, vector<1x768xf32>
    %37 = vector.broadcast %36 : vector<1x768xf32> to vector<8x768xf32>
    %38 = arith.mulf %35, %37 : vector<8x768xf32>
    %c19_i32 = arith.constant 19 : i32
    %39 = tpu.dynamic_rotate %38 by %c19_i32 dim 1 : vector<8x768xf32>, i32 -> vector<8x768xf32>
    %c0_18 = arith.constant 0 : index
    %c0_19 = arith.constant 0 : index
    %c0_20 = arith.constant 0 : index
    %40 = vector.load %arg4[%c0_18, %c0_19, %c0_20] : memref<3x8x24xf32, #tpu.memory_space<vmem>>, vector<1x8x24xf32>
    %41 = vector.shape_cast %40 : vector<1x8x24xf32> to vector<8x24xf32>
    %c767_i32_21 = arith.constant 767 : i32
    %42 = tpu.dynamic_rotate %39 by %c767_i32_21 dim 1 : vector<8x768xf32>, i32 -> vector<8x768xf32>
    %c766_i32_22 = arith.constant 766 : i32
    %43 = tpu.dynamic_rotate %39 by %c766_i32_22 dim 1 : vector<8x768xf32>, i32 -> vector<8x768xf32>
    %44 = tpu.concatenate %39, %42, %43 in 0 : vector<8x768xf32>, vector<8x768xf32>, vector<8x768xf32> -> vector<24x768xf32>
    %cst_23 = arith.constant dense<0.000000e+00> : vector<8x768xf32>
    %45 = tpu.matmul %41, %44, %cst_23 {dimension_numbers = #tpu.dot_dimension_numbers<[1], [0], [0], [1], [0, 0, 1, 1], [], []>} : vector<8x24xf32>, vector<24x768xf32>, vector<8x768xf32> -> vector<8x768xf32>
    %c1_24 = arith.constant 1 : index
    %c0_25 = arith.constant 0 : index
    %c0_26 = arith.constant 0 : index
    %46 = vector.load %arg4[%c1_24, %c0_25, %c0_26] : memref<3x8x24xf32, #tpu.memory_space<vmem>>, vector<1x8x24xf32>
    %47 = vector.shape_cast %46 : vector<1x8x24xf32> to vector<8x24xf32>
    %c750_i32_27 = arith.constant 750 : i32
    %48 = tpu.dynamic_rotate %39 by %c750_i32_27 dim 1 : vector<8x768xf32>, i32 -> vector<8x768xf32>
    %c749_i32_28 = arith.constant 749 : i32
    %49 = tpu.dynamic_rotate %39 by %c749_i32_28 dim 1 : vector<8x768xf32>, i32 -> vector<8x768xf32>
    %c748_i32_29 = arith.constant 748 : i32
    %50 = tpu.dynamic_rotate %39 by %c748_i32_29 dim 1 : vector<8x768xf32>, i32 -> vector<8x768xf32>
    %51 = tpu.concatenate %48, %49, %50 in 0 : vector<8x768xf32>, vector<8x768xf32>, vector<8x768xf32> -> vector<24x768xf32>
    %cst_30 = arith.constant dense<0.000000e+00> : vector<8x768xf32>
    %52 = tpu.matmul %47, %51, %cst_30 {dimension_numbers = #tpu.dot_dimension_numbers<[1], [0], [0], [1], [0, 0, 1, 1], [], []>} : vector<8x24xf32>, vector<24x768xf32>, vector<8x768xf32> -> vector<8x768xf32>
    %53 = arith.addf %45, %52 : vector<8x768xf32>
    %c2_31 = arith.constant 2 : index
    %c0_32 = arith.constant 0 : index
    %c0_33 = arith.constant 0 : index
    %54 = vector.load %arg4[%c2_31, %c0_32, %c0_33] : memref<3x8x24xf32, #tpu.memory_space<vmem>>, vector<1x8x24xf32>
    %55 = vector.shape_cast %54 : vector<1x8x24xf32> to vector<8x24xf32>
    %c732_i32_34 = arith.constant 732 : i32
    %56 = tpu.dynamic_rotate %39 by %c732_i32_34 dim 1 : vector<8x768xf32>, i32 -> vector<8x768xf32>
    %c731_i32_35 = arith.constant 731 : i32
    %57 = tpu.dynamic_rotate %39 by %c731_i32_35 dim 1 : vector<8x768xf32>, i32 -> vector<8x768xf32>
    %c730_i32_36 = arith.constant 730 : i32
    %58 = tpu.dynamic_rotate %39 by %c730_i32_36 dim 1 : vector<8x768xf32>, i32 -> vector<8x768xf32>
    %59 = tpu.concatenate %56, %57, %58 in 0 : vector<8x768xf32>, vector<8x768xf32>, vector<8x768xf32> -> vector<24x768xf32>
    %cst_37 = arith.constant dense<0.000000e+00> : vector<8x768xf32>
    %60 = tpu.matmul %55, %59, %cst_37 {dimension_numbers = #tpu.dot_dimension_numbers<[1], [0], [0], [1], [0, 0, 1, 1], [], []>} : vector<8x24xf32>, vector<24x768xf32>, vector<8x768xf32> -> vector<8x768xf32>
    %61 = arith.addf %53, %60 : vector<8x768xf32>
    %c0_38 = arith.constant 0 : index
    %c0_39 = arith.constant 0 : index
    %62 = vector.load %arg5[%c0_38, %c0_39] : memref<8x1xf32, #tpu.memory_space<vmem>>, vector<8x1xf32>
    %63 = vector.broadcast %62 : vector<8x1xf32> to vector<8x768xf32>
    %64 = arith.addf %61, %63 : vector<8x768xf32>
    %65 = vector.extract_strided_slice %26 {offsets = [8, 0], sizes = [8, 768], strides = [1, 1]} : vector<16x768xf32> to vector<8x768xf32>
    %66 = arith.addf %64, %65 : vector<8x768xf32>
    %c0_40 = arith.constant 0 : index
    %c0_41 = arith.constant 0 : index
    %67 = vector.load %arg8[%c0_40, %c0_41] : memref<8x8xf32, #tpu.memory_space<vmem>>, vector<8x8xf32>
    %c0_42 = arith.constant 0 : index
    %c0_43 = arith.constant 0 : index
    %68 = vector.load %arg6[%c0_42, %c0_43] : memref<8x1xf32, #tpu.memory_space<vmem>>, vector<8x1xf32>
    %c0_44 = arith.constant 0 : index
    %c0_45 = arith.constant 0 : index
    %69 = vector.load %arg7[%c0_44, %c0_45] : memref<8x1xf32, #tpu.memory_space<vmem>>, vector<8x1xf32>
    %70 = vector.extract_strided_slice %66 {offsets = [0, 0], sizes = [8, 384], strides = [1, 1]} : vector<8x768xf32> to vector<8x384xf32>
    %c0_46 = arith.constant 0 : index
    %c0_47 = arith.constant 0 : index
    %71 = vector.load %arg10[%c0_46, %c0_47] : memref<384x256xf32, #tpu.memory_space<vmem>>, vector<384x256xf32>
    %cst_48 = arith.constant dense<0.000000e+00> : vector<8x256xf32>
    %72 = tpu.matmul %70, %71, %cst_48 {dimension_numbers = #tpu.dot_dimension_numbers<[1], [0], [0], [1], [0, 0, 1, 1], [], []>} : vector<8x384xf32>, vector<384x256xf32>, vector<8x256xf32> -> vector<8x256xf32>
    %cst_49 = arith.constant dense<0.000000e+00> : vector<8xf32>
    %73 = vector.multi_reduction <add>, %72, %cst_49 [1] : vector<8x256xf32> to vector<8xf32>
    %74 = vector.shape_cast %73 : vector<8xf32> to vector<8x1xf32>
    %75 = arith.mulf %72, %72 : vector<8x256xf32>
    %cst_50 = arith.constant dense<0.000000e+00> : vector<8xf32>
    %76 = vector.multi_reduction <add>, %75, %cst_50 [1] : vector<8x256xf32> to vector<8xf32>
    %77 = vector.shape_cast %76 : vector<8xf32> to vector<8x1xf32>
    %78 = tpu.concatenate %74, %77 in 1 : vector<8x1xf32>, vector<8x1xf32> -> vector<8x2xf32>
    %cst_51 = arith.constant dense<0.000000e+00> : vector<8x2xf32>
    %79 = tpu.matmul %67, %78, %cst_51 {dimension_numbers = #tpu.dot_dimension_numbers<[1], [0], [0], [1], [0, 0, 1, 1], [], []>} : vector<8x8xf32>, vector<8x2xf32>, vector<8x2xf32> -> vector<8x2xf32>
    %80 = vector.extract_strided_slice %79 {offsets = [0, 0], sizes = [8, 1], strides = [1, 1]} : vector<8x2xf32> to vector<8x1xf32>
    %cst_52 = arith.constant 0.001953125 : f32
    %81 = vector.broadcast %cst_52 : f32 to vector<8x1xf32>
    %82 = arith.mulf %80, %81 : vector<8x1xf32>
    %83 = vector.extract_strided_slice %79 {offsets = [0, 1], sizes = [8, 1], strides = [1, 1]} : vector<8x2xf32> to vector<8x1xf32>
    %cst_53 = arith.constant 0.001953125 : f32
    %84 = vector.broadcast %cst_53 : f32 to vector<8x1xf32>
    %85 = arith.mulf %83, %84 : vector<8x1xf32>
    %86 = arith.mulf %82, %82 : vector<8x1xf32>
    %87 = arith.subf %85, %86 : vector<8x1xf32>
    %88 = vector.broadcast %82 : vector<8x1xf32> to vector<8x256xf32>
    %89 = arith.subf %72, %88 : vector<8x256xf32>
    %cst_54 = arith.constant 9.99999974E-6 : f32
    %90 = vector.broadcast %cst_54 : f32 to vector<8x1xf32>
    %91 = arith.addf %87, %90 : vector<8x1xf32>
    %92 = math.rsqrt %91 : vector<8x1xf32>
    %93 = vector.broadcast %92 : vector<8x1xf32> to vector<8x256xf32>
    %94 = arith.mulf %89, %93 : vector<8x256xf32>
    %95 = vector.broadcast %68 : vector<8x1xf32> to vector<8x256xf32>
    %96 = arith.mulf %94, %95 : vector<8x256xf32>
    %97 = vector.broadcast %69 : vector<8x1xf32> to vector<8x256xf32>
    %98 = arith.addf %96, %97 : vector<8x256xf32>
    %99 = vector.extract_strided_slice %66 {offsets = [0, 384], sizes = [8, 384], strides = [1, 1]} : vector<8x768xf32> to vector<8x384xf32>
    %c0_55 = arith.constant 0 : index
    %c0_56 = arith.constant 0 : index
    %100 = vector.load %arg10[%c0_55, %c0_56] : memref<384x256xf32, #tpu.memory_space<vmem>>, vector<384x256xf32>
    %cst_57 = arith.constant dense<0.000000e+00> : vector<8x256xf32>
    %101 = tpu.matmul %99, %100, %cst_57 {dimension_numbers = #tpu.dot_dimension_numbers<[1], [0], [0], [1], [0, 0, 1, 1], [], []>} : vector<8x384xf32>, vector<384x256xf32>, vector<8x256xf32> -> vector<8x256xf32>
    %cst_58 = arith.constant dense<0.000000e+00> : vector<8xf32>
    %102 = vector.multi_reduction <add>, %101, %cst_58 [1] : vector<8x256xf32> to vector<8xf32>
    %103 = vector.shape_cast %102 : vector<8xf32> to vector<8x1xf32>
    %104 = arith.mulf %101, %101 : vector<8x256xf32>
    %cst_59 = arith.constant dense<0.000000e+00> : vector<8xf32>
    %105 = vector.multi_reduction <add>, %104, %cst_59 [1] : vector<8x256xf32> to vector<8xf32>
    %106 = vector.shape_cast %105 : vector<8xf32> to vector<8x1xf32>
    %107 = tpu.concatenate %103, %106 in 1 : vector<8x1xf32>, vector<8x1xf32> -> vector<8x2xf32>
    %cst_60 = arith.constant dense<0.000000e+00> : vector<8x2xf32>
    %108 = tpu.matmul %67, %107, %cst_60 {dimension_numbers = #tpu.dot_dimension_numbers<[1], [0], [0], [1], [0, 0, 1, 1], [], []>} : vector<8x8xf32>, vector<8x2xf32>, vector<8x2xf32> -> vector<8x2xf32>
    %109 = vector.extract_strided_slice %108 {offsets = [0, 0], sizes = [8, 1], strides = [1, 1]} : vector<8x2xf32> to vector<8x1xf32>
    %cst_61 = arith.constant 0.001953125 : f32
    %110 = vector.broadcast %cst_61 : f32 to vector<8x1xf32>
    %111 = arith.mulf %109, %110 : vector<8x1xf32>
    %112 = vector.extract_strided_slice %108 {offsets = [0, 1], sizes = [8, 1], strides = [1, 1]} : vector<8x2xf32> to vector<8x1xf32>
    %cst_62 = arith.constant 0.001953125 : f32
    %113 = vector.broadcast %cst_62 : f32 to vector<8x1xf32>
    %114 = arith.mulf %112, %113 : vector<8x1xf32>
    %115 = arith.mulf %111, %111 : vector<8x1xf32>
    %116 = arith.subf %114, %115 : vector<8x1xf32>
    %117 = vector.broadcast %111 : vector<8x1xf32> to vector<8x256xf32>
    %118 = arith.subf %101, %117 : vector<8x256xf32>
    %cst_63 = arith.constant 9.99999974E-6 : f32
    %119 = vector.broadcast %cst_63 : f32 to vector<8x1xf32>
    %120 = arith.addf %116, %119 : vector<8x1xf32>
    %121 = math.rsqrt %120 : vector<8x1xf32>
    %122 = vector.broadcast %121 : vector<8x1xf32> to vector<8x256xf32>
    %123 = arith.mulf %118, %122 : vector<8x256xf32>
    %124 = vector.broadcast %68 : vector<8x1xf32> to vector<8x256xf32>
    %125 = arith.mulf %123, %124 : vector<8x256xf32>
    %126 = vector.broadcast %69 : vector<8x1xf32> to vector<8x256xf32>
    %127 = arith.addf %125, %126 : vector<8x256xf32>
    %128 = tpu.concatenate %98, %127 in 1 : vector<8x256xf32>, vector<8x256xf32> -> vector<8x512xf32>
    %c0_64 = arith.constant 0 : index
    %c0_65 = arith.constant 0 : index
    %c0_66 = arith.constant 0 : index
    %129 = vector.load %arg11[%c0_64, %c0_65, %c0_66] : memref<1x8x512xf32, #tpu.memory_space<vmem>>, vector<1x8x512xf32>
    %130 = vector.shape_cast %129 : vector<1x8x512xf32> to vector<8x512xf32>
    %131 = vector.shape_cast %128 : vector<8x512xf32> to vector<1x8x512xf32>
    tpu.vector_store %arg11[%c0_64, %c0_65, %c0_66], %131 {strides = array<i32>} : memref<1x8x512xf32, #tpu.memory_space<vmem>>, vector<1x8x512xf32>,
    return
  }
  func.func @transform_0(%arg0: i32) -> (i32, i32, i32) {
    %c0_i32 = arith.constant 0 : i32
    %c0_i32_0 = arith.constant 0 : i32
    %c0_i32_1 = arith.constant 0 : i32
    return %arg0, %c0_i32, %c0_i32_0 : i32, i32, i32
  }
  func.func @transform_1(%arg0: i32) -> (i32, i32, i32) {
    %c0_i32 = arith.constant 0 : i32
    %c0_i32_0 = arith.constant 0 : i32
    %c0_i32_1 = arith.constant 0 : i32
    %c0_i32_2 = arith.constant 0 : i32
    return %c0_i32, %c0_i32_0, %c0_i32_1 : i32, i32, i32
  }
  func.func @transform_2(%arg0: i32) -> (i32, i32) {
    %c0_i32 = arith.constant 0 : i32
    %c0_i32_0 = arith.constant 0 : i32
    %c0_i32_1 = arith.constant 0 : i32
    return %c0_i32, %c0_i32_0 : i32, i32
  }
  func.func @transform_3(%arg0: i32) -> (i32, i32, i32) {
    %c0_i32 = arith.constant 0 : i32
    %c0_i32_0 = arith.constant 0 : i32
    %c0_i32_1 = arith.constant 0 : i32
    %c0_i32_2 = arith.constant 0 : i32
    return %c0_i32, %c0_i32_0, %c0_i32_1 : i32, i32, i32
  }
  func.func @transform_4(%arg0: i32) -> (i32, i32) {
    %c0_i32 = arith.constant 0 : i32
    %c0_i32_0 = arith.constant 0 : i32
    %c0_i32_1 = arith.constant 0 : i32
    return %c0_i32, %c0_i32_0 : i32, i32
  }
  func.func @transform_5(%arg0: i32) -> (i32, i32) {
    %c0_i32 = arith.constant 0 : i32
    %c0_i32_0 = arith.constant 0 : i32
    %c0_i32_1 = arith.constant 0 : i32
    return %c0_i32, %c0_i32_0 : i32, i32
  }
  func.func @transform_6(%arg0: i32) -> (i32, i32) {
    %c0_i32 = arith.constant 0 : i32
    %c0_i32_0 = arith.constant 0 : i32
    %c0_i32_1 = arith.constant 0 : i32
    return %c0_i32, %c0_i32_0 : i32, i32
  }
  func.func @transform_7(%arg0: i32) -> (i32, i32) {
    %c0_i32 = arith.constant 0 : i32
    %c0_i32_0 = arith.constant 0 : i32
    %c0_i32_1 = arith.constant 0 : i32
    return %c0_i32, %c0_i32_0 : i32, i32
  }
  func.func @transform_8(%arg0: i32) -> (i32, i32) {
    %c0_i32 = arith.constant 0 : i32
    %c0_i32_0 = arith.constant 0 : i32
    %c0_i32_1 = arith.constant 0 : i32
    return %c0_i32, %c0_i32_0 : i32, i32
  }
  func.func @transform_9(%arg0: i32) -> (i32, i32) {
    %c0_i32 = arith.constant 0 : i32
    %c0_i32_0 = arith.constant 0 : i32
    %c0_i32_1 = arith.constant 0 : i32
    return %c0_i32, %c0_i32_0 : i32, i32
  }
  func.func @transform_10(%arg0: i32) -> (i32, i32, i32) {
    %c0_i32 = arith.constant 0 : i32
    %c0_i32_0 = arith.constant 0 : i32
    %c0_i32_1 = arith.constant 0 : i32
    return %arg0, %c0_i32, %c0_i32_0 : i32, i32, i32
  }
}

</mosaic_0001>

<bundles_post_ra>
// kernel: tpu_custom_call.1
= control target key start
LH: loop header
LB: loop body
LE: loop exit
PB: predicated region body
PF: predicated region fallthrough
CT: control target
= control target key end

     0   :  { %s4847_s0 = inlined_call_operand.hbm [shape: f32[2,8,768], index: 0, kind: input, shape index: {}]   ;;  %s4848_s1 = inlined_call_operand.hbm [shape: f32[3,16,24], index: 1, kind: input, shape index: {}]   ;;  %s4849_s2 = inlined_call_operand.vmem [shape: f32[16,1], index: 2, kind: input, shape index: {}]   ;;  %s4850_s3 = inlined_call_operand.vmem [shape: f32[3,8,24], index: 3, kind: input, shape index: {}]   ;;  %s4851_s4 = inlined_call_operand.vmem [shape: f32[8,1], index: 4, kind: input, shape index: {}]   ;;  %s4852_s5 = inlined_call_operand.vmem [shape: f32[8,1], index: 5, kind: input, shape index: {}]   ;;  %s4853_s6 = inlined_call_operand.vmem [shape: f32[8,1], index: 6, kind: input, shape index: {}]   ;;  %s4854_s7 = inlined_call_operand.vmem [shape: f32[8,8], index: 7, kind: input, shape index: {}]   ;;  %s4855_s8 = inlined_call_operand.vmem [shape: f32[1,768], index: 8, kind: input, shape index: {}]   ;;  %s4856_s9 = inlined_call_operand.hbm [shape: f32[384,256], index: 9, kind: input, shape index: {}]   ;;  %s4857_s10 = inlined_call_operand.hbm [shape: f32[2,8,512], index: 10, kind: output, shape index: {}]  }
   0x1   :  { %4868 = sst [smem:[#allocation15_spill]] %s4848_s1 }
   0x2   :  { %4869 = sst [smem:[#allocation16_spill]] %s4856_s9 }
   0x3   :  { %15 = vsyncpa [#allocation3], 0 }
   0x4   :  { %17 = vsyncpa [#allocation3 + $0x1], 0 }
   0x5   :  { %18 = vsyncpa [#allocation6], 0 }
   0x6   :  { %19 = vsyncpa [#allocation4], 0 }
   0x7   :  { %21 = vsyncpa [#allocation4 + $0x1], 0  ;;  %s3796_s13 = smov 0   ;;  %s3798_s14 = smov 0  }
   0x8   :  { %s3800_s15 = smov 0   ;;  %s3802_s16 = smov 0  }
   0x9 LB: > { %4870 = sst [smem:[#allocation12_spill]] %s3705_s13  ;;  %s3817_s17 = sadd.s32 4294967295, %s3717_s16   ;;  %s3717_s16 = sphi %s3802_s16, %s4896_s16   ;;  %s3713_s15 = sphi %s3800_s15, %s4895_s15   ;;  %s3709_s14 = sphi %s3798_s14, %s4894_s14   ;;  %s3705_s13 = sphi %s3796_s13, %s4893_s13  }
   0xa   : > { %s2947_s18 = sadd.s32 4294967294, %s3717_s16   ;;  %p47_p0 = scmp.ne.s32.totalorder %s3709_s14, %s3705_s13 }
   0xb   : > { %p4858_p1 = scmp.eq.s32.totalorder %s3817_s17, 0  ;;  %p266_p3 = scmp.eq.s32.totalorder %s2947_s18, 1 }
   0xc   : > { %p2948_p5 = scmp.ge.s32.totalorder %s3717_s16, 1  ;;  %p273_p7 = scmp.lt.s32.totalorder %s3717_s16, 3 }
   0xd   : > { %p3826_p4 = por %p4858_p1, %p47_p0  ;;  %p3831_p6 = por %p266_p3, %p47_p0 }
   0xe   : > { %p3836_p8 = pnand %p2948_p5, %p273_p7  ;;  %s3719_s22 = smov [#allocation5]  }
   0xf   : > { %s4871_s19 = scalar_select %p3826_p4, 1, 0 }
  0x10   : > { %s4872_s20 = scalar_select %p3831_p6, 1, 0 }
  0x11   : > { %s285_s23 = sshll.u32 %s3719_s22, 4  ;;  %p3345_p9 = pneg %p3836_p8  ;;  %s3840_s23 = int_to_ptr.vmem [resolvable:$true] %s285_s23 }
  0x12   : > { %4873 = sst [smem:[#allocation13_spill]] %s4872_s20  ;;  %s3720_s25 = smov [#allocation7]  }
  0x13   : > { %p3847_p11 = pnand %p3345_p9, %p4858_p1  ;;  %s319_s26 = sshll.u32 %s3720_s25, 4  ;;  %s3851_s26 = int_to_ptr.vmem [resolvable:$true] %s319_s26 }
  0x14   : > { %s4876_s1 = sld [smem:[#allocation15_spill]] }
  0x15   : > { %p3563_p13 = pneg %p3847_p11 }
  0x1a   : > { %s3561_s29 = scalar_lea.hbm %s4876_s1, 768 }
  0x1b   : > { %p3562_p12 = scmp.ne.s32.totalorder %s4876_s1, %s3561_s29  ;;  %p3568_p5 = scmp.lt.u32.totalorder %s3561_s29, %s4876_s1 }
  0x1d   : > { %p3564_p0 = pnand %p3563_p13, %p3562_p12 }
  0x1f   : > { %p3565_p3 = pneg %p3564_p0 }
  0x21   : > { %p3570_p7 = pnand %p3568_p5, %p3565_p3 }
  0x23   : > { %3573 = shalt.err (!%p3570_p7)
}
  0x24   : > { %s3574_s22 = scalar_lea.vmem %s3840_s23, 768  ;;  %p3582_p2 = scmp.lt.s32.totalorder %s3840_s23, %s3840_s23 }
  0x25   : > { %p3575_p9 = scmp.ne.s32.totalorder %s3840_s23, %s3574_s22  ;;  %p3583_p12 = scmp.lt.s32.totalorder %s3574_s22, %s3574_s22 }
  0x27   : > { %p3577_p10 = pnand %p3575_p9, %p3563_p13  ;;  %p3584_p0 = por %p3583_p12, %p3582_p2 }
  0x29   : > { %p3578_p1 = pneg %p3577_p10 }
  0x2b   : > { %p3585_p6 = pnand %p3584_p0, %p3578_p1 }
  0x2d   : > { %3588 = shalt.err (!%p3585_p6)
}
  0x2e   : > { %s3721_s25 = smov 128   ;;  %s3722_s27 = smov 8  }
  0x2f   : > { %3348 = dma.hbm_to_vmem [thread:$0]  (!%p3847_p11), %s4876_s1, 768, %s3840_s23, [#allocation6], %s3721_s25, %s3721_s25, %s3722_s27  }
  0x30   : > { %s4877_s9 = sld [smem:[#allocation16_spill]] }
  0x36   : > { %s3589_s12 = scalar_lea.hbm %s4877_s9, 12288 }
  0x37   : > { %p3590_p2 = scmp.ne.s32.totalorder %s4877_s9, %s3589_s12  ;;  %p3596_p10 = scmp.lt.u32.totalorder %s3589_s12, %s4877_s9 }
  0x39   : > { %p3592_p1 = pnand %p3590_p2, %p3563_p13 }
  0x3b   : > { %p3593_p6 = pneg %p3592_p1 }
  0x3d   : > { %p3598_p3 = pnand %p3596_p10, %p3593_p6 }
  0x3f   : > { %3601 = shalt.err (!%p3598_p3)
}
  0x40   : > { %s3602_s23 = scalar_lea.vmem %s3851_s26, 12288  ;;  %p3610_p12 = scmp.lt.s32.totalorder %s3851_s26, %s3851_s26 }
  0x41   : > { %p3603_p5 = scmp.ne.s32.totalorder %s3851_s26, %s3602_s23  ;;  %p3611_p0 = scmp.lt.s32.totalorder %s3602_s23, %s3602_s23 }
  0x43   : > { %p3605_p7 = pnand %p3603_p5, %p3563_p13  ;;  %p3612_p2 = por %p3611_p0, %p3610_p12 }
  0x45   : > { %p3606_p9 = pneg %p3605_p7 }
  0x47   : > { %p3613_p1 = pnand %p3612_p2, %p3606_p9 }
  0x49   : > { %3616 = shalt.err (!%p3613_p1)
}
  0x4a   : > { %s3723_s13 = smov 256   ;;  %s3724_s20 = smov 16  }
  0x4b   : > { %3351 = dma.hbm_to_vmem [thread:$0]  (!%p3847_p11), %s4877_s9, 12288, %s3851_s26, [#allocation6], %s3723_s13, %s3723_s13, %s3724_s20  }
  0x4c   : > { %s3906_s28 = sadd.s32 1, %s3717_s16   ;;  %s34_s30 = sadd.s32 1, %s3713_s15 }
  0x4d   : > { %s31_s29 = ssub.s32 %s3717_s16, %s3906_s28  ;;  %p41_p6 = scmp.ne.s32.totalorder %s3713_s15, %s3709_s14 }
  0x4e   : > { %p32_p13 = scmp.eq.s32.totalorder %s31_s29, 0  ;;  %p42_p10 = scmp.eq.s32.totalorder %s3717_s16, 0 }
  0x4f   : > { %p4878_p5 = scmp.eq.s32.totalorder %s3817_s17, 1  ;;  %p3362_p9 = scmp.lt.s32.totalorder %s3717_s16, 2 }
  0x50   : > { %s3915_s11 = scalar_select %p32_p13, %s3713_s15, %s34_s30  }
  0x51   : > { %p43_p3 = por %p42_p10, %p41_p6  ;;  %p3919_p7 = por %p4878_p5, %p41_p6 }
  0x52   : > { %s333_s24 = sand.u32 1, %s3713_s15   ;;  %s3331_s26 = smul.u32 768, %s3717_s16 }
  0x53   : > { %s4879_s12 = scalar_select %p3919_p7, 1, 0 }
  0x54   : > { %s3330_s18 = smul.u32 48, %s333_s24  ;;  %p3926_p11 = pnand %p3362_p9, %p43_p3 }
  0x55   : > { %s3933_s20 = scalar_lea.hbm %s4847_s0, %s3331_s26  ;;  %s334_s29 = scalar_lea.sflag [#allocation3], %s333_s24 }
  0x56   : > { %s337_s25 = scalar_lea.vmem [#allocation2], %s3330_s18  ;;  %s3617_s30 = scalar_lea.hbm %s3933_s20, 768 }
  0x57   : > { %s345_s27 = sshll.u32 %s337_s25, 4  ;;  %p3618_p12 = scmp.ne.s32.totalorder %s3933_s20, %s3617_s30  ;;  %s3935_s27 = int_to_ptr.vmem [resolvable:$true] %s345_s27 }
  0x58   : > { %p3619_p0 = pneg %p3926_p11  ;;  %s3622_s13 = scalar_lea.hbm %s4847_s0, 1536 }
  0x59   : > { %p3623_p13 = scmp.lt.u32.totalorder %s3933_s20, %s4847_s0  ;;  %p3624_p6 = scmp.lt.u32.totalorder %s3622_s13, %s3617_s30 }
  0x5a   : > { %p3620_p2 = pnand %p3619_p0, %p3618_p12  ;;  %p3626_p3 = scmp.lt.u32.totalorder %s3617_s30, %s3933_s20 }
  0x5b   : > { %p3625_p10 = por %p3624_p6, %p3623_p13 }
  0x5c   : > { %p3621_p1 = pneg %p3620_p2 }
  0x5d   : > { %p3627_p5 = por %p3626_p3, %p3625_p10 }
  0x5f   : > { %p3628_p9 = pnand %p3627_p5, %p3621_p1 }
  0x61   : > { %3631 = shalt.err (!%p3628_p9)
}
  0x62   : > { %s3632_s24 = scalar_lea.vmem %s3935_s27, 768  ;;  %s3725_s18 = smov [#allocation2]  }
  0x63   : > { %p3633_p12 = scmp.ne.s32.totalorder %s3935_s27, %s3632_s24  ;;  %s3637_s25 = sshll.u32 %s3725_s18, 4  ;;  %s3638_s25 = int_to_ptr.vmem [resolvable:$false] %s3637_s25 }
  0x64   : > { %s3639_s1 = scalar_lea.vmem %s3638_s25, 1536  ;;  %p3640_p4 = scmp.lt.s32.totalorder %s3935_s27, %s3638_s25 }
  0x65   : > { %p3635_p2 = pnand %p3633_p12, %p3619_p0  ;;  %p3641_p13 = scmp.lt.s32.totalorder %s3639_s1, %s3632_s24 }
  0x67   : > { %p3636_p7 = pneg %p3635_p2  ;;  %p3642_p6 = por %p3641_p13, %p3640_p4 }
  0x69   : > { %p3643_p10 = pnand %p3642_p6, %p3636_p7 }
  0x6b   : > { %3646 = shalt.err (!%p3643_p10)
}
  0x6c   : > { %3355 = dma.hbm_to_vmem [thread:$0]  (!%p3926_p11), %s3933_s20, 768, %s3935_s27, %s334_s29  }
  0x6d   : > { %354 = sbr.rel (%p3836_p8) target bundleno = 2367 (0x93f), region = 60 }
  0x74   : > { %s3965_s9 = sand.u32 1, %s3709_s14   ;;  %p4881_p4 = scmp.ne.s32.totalorder %s4871_s19, 0 }
  0x75   : > { %s3332_s30 = smul.u32 48, %s3965_s9  ;;  %s357_s23 = scalar_lea.sflag [#allocation3], %s3965_s9 }
  0x77   : > { %s360_s26 = scalar_lea.vmem [#allocation2], %s3332_s30 }
  0x78   : > { %3692 = dma.done.wait (%p4881_p4), %s357_s23, 768  }
  0x79   : > { %3694 = vsyncadd (%p4881_p4), %s357_s23, 4294966528  ;;  %p4882_p7 = scmp.eq.s32.totalorder %s3817_s17, 0 }
  0x7b   : > { %3696 = dma.done.wait (%p4882_p7), [#allocation6], 13056   ;;  %p4883_p11 = pmov %p4882_p7 }
  0x7c   : > { %v3977_v0 = vld [vmem:[%s360_s26 + $0x8] sm:$0xff]  ;;  %v3979_v1 = vld [vmem:[%s360_s26 + $0x10] sm:$0xff]  ;;  %v3981_v2 = vld [vmem:[%s360_s26] sm:$0xff]  ;;  %s3726_s19 = smov 110   ;;  %s3727_s21 = smov 109   ;;  %v4865_v8 = vmov 0.0   ;;  %v425_v14 = vlaneseq }
  0x7d   : > { %3698 = vsyncadd (%p4883_p11), [#allocation6], 4294954240  ;;  %v3418_v3 = vpack.i.bf16 %v3979_v1, %v3977_v0  ;;  %v3985_v4 = vld [vmem:[%s360_s26 + $0x18] sm:$0xff]  ;;  %v3993_v6 = vld [vmem:[%s360_s26 + $0x20] sm:$0xff]  ;;  %584 = vmatprep.mubr.f32.mxu0 %v4865_v8  ;;  %898 = vmatprep.mubr.f32.mxu1 %v4865_v8  ;;  %s3729_s22 = smov 108   ;;  %s3730_s20 = smov 127  }
  0x7e   : > { %v3428_v5 = vpack.i.bf16 %v3985_v4, %v3981_v2  ;;  %v3995_v7 = vld [vmem:[%s360_s26 + $0x28] sm:$0xff]  ;;  %s3731_s27 = smov 126   ;;  %v3458_v11 = vpack.i.bf16 %v3985_v4, %v3993_v6  ;;  %s3732_s29 = smov 92   ;;  %v4863_v12 = vmov 0   ;;  %v1297_v13 = vld [vmem:[%s4849_s2] sm:$0xff]  ;;  %v4061_v16 = vand.u32 127, %v425_v14 }
  0x7f   : > { %3419 = vrot.lane.b32.xlu0 %v3418_v3, %s3726_s19  ;;  %v3438_v9 = vpack.i.bf16 %v3995_v7, %v3993_v6  ;;  %v3453_v10 = vpack.i.bf16 %v3995_v7, %v3981_v2  ;;  %s3733_s13 = smov 91   ;;  %s3734_s24 = smov 90   ;;  %3539 = vset.pattern.permute.xlu1 %v4863_v12  ;;  %v4081_v38 = vld [vmem:[#allocation5 + $0x10] sm:$0xff]  ;;  %vm513_vm3 = vcmask 195584   ;;  %v4087_v45 = vld [vmem:[#allocation5 + $0x18] sm:$0xff]  ;;  %vm3737_vm10 = vmmov 0  }
  0x80   : > { %3429 = vrot.lane.b32.xlu1 %v3428_v5, %s3726_s19  ;;  %3488 = vset.pattern.permute.xlu0 %v4863_v12  ;;  %vm468_vm0 = vcmp.lt.s32.totalorder %v4061_v16, 110  ;;  %vm487_vm1 = vcmp.lt.s32.totalorder %v4061_v16, 109  ;;  %vm506_vm2 = vcmp.lt.s32.totalorder %v4061_v16, 108  ;;  %vm427_vm4 = vcmp.lt.s32.totalorder %v4061_v16, 127  ;;  %s3736_s23 = smov 19   ;;  %s3738_s30 = smov 1  }
  0x81   : > { %vm446_vm5 = vcmp.lt.s32.totalorder %v4061_v16, 126  ;;  %vm1003_vm6 = vcmp.lt.s32.totalorder %v4061_v16, 92  ;;  %vm1022_vm7 = vcmp.lt.s32.totalorder %v4061_v16, 91  ;;  %vm1041_vm8 = vcmp.lt.s32.totalorder %v4061_v16, 90  ;;  %p4888_p0 = scmp.ne.s32.totalorder %s4879_s12, 0  ;;  %s3740_s1 = smov [#allocation8]  }
  0x82   : > { %vm1401_vm9 = vcmp.lt.s32.totalorder %v4061_v16, 19  ;;  %v2265_v16 = vld [vmem:[#allocation7 + $0x108] sm:$0xff]  ;;  %vm2478_vm11 = vcmask 7168   ;;  %vm2480_vm12 = vcmask 64512  }
  0x83   : > { %3424 = vrot.lane.b32.xlu0 %v3418_v3, %s3727_s21 }
  0x84   : > { %3434 = vrot.lane.b32.xlu1 %v3428_v5, %s3727_s21 }
  0x87   : > { %496 = vrot.lane.b32.xlu0 %v3977_v0, %s3729_s22 }
  0x88   : > { %498 = vrot.lane.b32.xlu1 %v3979_v1, %s3729_s22 }
  0x8b   : > { %494 = vrot.lane.b32.xlu0 %v3981_v2, %s3729_s22 }
  0x8c   : > { %3439 = vrot.lane.b32.xlu1 %v3438_v9, %s3726_s19 }
  0x8f   : > { %3444 = vrot.lane.b32.xlu0 %v3438_v9, %s3727_s21 }
  0x90   : > { %500 = vrot.lane.b32.xlu1 %v3985_v4, %s3729_s22 }
  0x93   : > { %502 = vrot.lane.b32.xlu0 %v3993_v6, %s3729_s22 }
  0x94   : > { %504 = vrot.lane.b32.xlu1 %v3995_v7, %s3729_s22 }
  0x97   : > { %3449 = vrot.lane.b32.xlu0 %v3418_v3, %s3730_s20 }
  0x98   : > { %3454 = vrot.lane.b32.xlu1 %v3453_v10, %s3730_s20 }
  0x9b   : > { %436 = vrot.lane.b32.xlu0 %v3977_v0, %s3731_s27 }
  0x9c   : > { %438 = vrot.lane.b32.xlu1 %v3979_v1, %s3731_s27 }
  0x9f   : > { %434 = vrot.lane.b32.xlu0 %v3981_v2, %s3731_s27 }
  0xa0   : > { %3459 = vrot.lane.b32.xlu1 %v3458_v11, %s3730_s20 }
  0xa3   : > { %444 = vrot.lane.b32.xlu0 %v3995_v7, %s3731_s27 }
  0xa4   : > { %442 = vrot.lane.b32.xlu1 %v3993_v6, %s3731_s27 }
  0xa7   : > { %3464 = vrot.lane.b32.xlu0 %v3418_v3, %s3732_s29 }
  0xa8   : > { %3469 = vrot.lane.b32.xlu1 %v3418_v3, %s3733_s13 }
  0xab   : > { %3474 = vrot.lane.b32.xlu0 %v3428_v5, %s3732_s29 }
  0xac   : > { %3479 = vrot.lane.b32.xlu1 %v3428_v5, %s3733_s13 }
  0xaf   : > { %440 = vrot.lane.b32.xlu0 %v3985_v4, %s3731_s27 }
  0xb0   : > { %3484 = vrot.lane.b32.xlu1 %v3438_v9, %s3732_s29 }
  0xb3   : > { %1018 = vrot.lane.b32.xlu0 %v3993_v6, %s3733_s13 }
  0xb4   : > { %1031 = vrot.lane.b32.xlu1 %v3977_v0, %s3734_s24 }
  0xb7   : > { %1033 = vrot.lane.b32.xlu0 %v3979_v1, %s3734_s24 }
  0xb8   : > { %1029 = vrot.lane.b32.xlu1 %v3981_v2, %s3734_s24 }
  0xbb   : > { %1020 = vrot.lane.b32.xlu0 %v3995_v7, %s3733_s13 }
  0xbc   : > { %1035 = vrot.lane.b32.xlu1 %v3985_v4, %s3734_s24 }
  0xbf   : > { %1037 = vrot.lane.b32.xlu0 %v3993_v6, %s3734_s24 }
  0xc0   : > { %1039 = vrot.lane.b32.xlu1 %v3995_v7, %s3734_s24 }
  0xc3   : > { %1301 = vperm.xlu0 %3488, %v1297_v13  }
  0xf1   : > { %v3420_v15 = vpop.permute.xlu0 %3419 }
  0xf2   : > { %v4063_v17 = vpop.permute.xlu1 %3429  ;;  %v3422_v18 = vunpack.i.h.bf16 %v3420_v15  ;;  %v3421_v19 = vunpack.i.l.bf16 %v3420_v15 }
  0xf3   : > { %v3431_v20 = vunpack.i.l.bf16 %v4063_v17  ;;  %v3432_v41 = vunpack.i.h.bf16 %v4063_v17 }
  0xf4   : > { %v472_v26 = vsel %vm468_vm0, %v3421_v19, %v3422_v18 }
  0xf5   : > { %v3425_v21 = vpop.permute.xlu0 %3424  ;;  %v473_v30 = vsel %vm468_vm0, %v3431_v20, %v3421_v19  ;;  %v471_v50 = vsel %vm468_vm0, %v3422_v18, %v3432_v41 }
  0xf6   : > { %v3427_v22 = vunpack.i.h.bf16 %v3425_v21  ;;  %v3426_v23 = vunpack.i.l.bf16 %v3425_v21  ;;  %v3435_v24 = vpop.permute.xlu1 %3434 }
  0xf7   : > { %v3436_v25 = vunpack.i.l.bf16 %v3435_v24  ;;  %v3437_v39 = vunpack.i.h.bf16 %v3435_v24 }
  0xf8   : > { %v491_v27 = vsel %vm487_vm1, %v3426_v23, %v3427_v22 }
  0xf9   : > { %v497_v28 = vpop.permute.xlu0 %496  ;;  %v3008_v29 = vpack.c.bf16 %v491_v27, %v472_v26  ;;  %v492_v31 = vsel %vm487_vm1, %v3436_v25, %v3426_v23  ;;  %v490_v46 = vsel %vm487_vm1, %v3427_v22, %v3437_v39 }
  0xfa   : > { %v499_v32 = vpop.permute.xlu1 %498  ;;  %v3010_v33 = vpack.c.bf16 %v492_v31, %v473_v30  ;;  %v3014_v53 = vpack.c.bf16 %v490_v46, %v471_v50  ;;  %v412_v46 = vld [vmem:[#allocation5 + $0x8] sm:$0xff] }
  0xfb   : > { %3009 = vmatprep.subr.bf16.mxu0 %v3008_v29  ;;  %v510_v34 = vsel %vm506_vm2, %v497_v28, %v499_v32 }
  0xfc   : > { %3011 = vmatpush1.bf16.msra.mxu0 %v3010_v33 }
  0xfd   : > { %v495_v35 = vpop.permute.xlu0 %494  ;;  %524 = vmatprep.subr.mxu0 %v510_v34 }
  0xfe   : > { %v3440_v36 = vpop.permute.xlu1 %3439  ;;  %v511_v37 = vsel %vm506_vm2, %v495_v35, %v497_v28 }
  0xff   : > { %v3441_v40 = vunpack.i.l.bf16 %v3440_v36  ;;  %v3442_v54 = vunpack.i.h.bf16 %v3440_v36 }
 0x100   : > { %525 = vmatpush1.msra.mxu0 %v511_v37 }
 0x101   : > { %v3445_v42 = vpop.permute.xlu0 %3444  ;;  %2957 = vmatmul.mubr.msk.f32.vlgmr.msra.gmra.mrb[0].mxu0 %vm513_vm3, %v4081_v38  ;;  %v470_v48 = vsel %vm468_vm0, %v3432_v41, %v3441_v40  ;;  %v469_v58 = vsel %vm468_vm0, %v3441_v40, %v3442_v54  ;;  %v474_v3 = vsel %vm468_vm0, %v3442_v54, %v3431_v20 }
 0x102   : > { %v3446_v43 = vunpack.i.l.bf16 %v3445_v42  ;;  %v501_v44 = vpop.permute.xlu1 %500  ;;  %590 = vmatprep.mubr.f32.mxu0 %v4865_v8  ;;  %v3447_v47 = vunpack.i.h.bf16 %v3445_v42 }
 0x103   : > { %v509_v5 = vsel %vm506_vm2, %v499_v32, %v501_v44 }
 0x104   : > { %v489_v49 = vsel %vm487_vm1, %v3437_v39, %v3446_v43  ;;  %v493_v57 = vsel %vm487_vm1, %v3447_v47, %v3436_v25  ;;  %v488_v59 = vsel %vm487_vm1, %v3446_v43, %v3447_v47 }
 0x105   : > { %v503_v51 = vpop.permute.xlu0 %502  ;;  %v3012_v52 = vpack.c.bf16 %v489_v49, %v470_v48  ;;  %2958 = vmatmul.mubr.msk.f32.gmra.mrb[2].mxu0 %vm513_vm3, %v4087_v45  ;;  %v3016_v9 = vpack.c.bf16 %v493_v57, %v474_v3  ;;  %v3018_v10 = vpack.c.bf16 %v488_v59, %v469_v58 }
 0x106   : > { %v505_v55 = vpop.permute.xlu1 %504  ;;  %661 = vmatprep.mubr.f32.mxu0 %v4865_v8  ;;  %v508_v56 = vsel %vm506_vm2, %v501_v44, %v503_v51 }
 0x107   : > { %3013 = vmatprep.subr.bf16.mxu0 %v3012_v52  ;;  %v512_v17 = vsel %vm506_vm2, %v505_v55, %v495_v35  ;;  %v507_v19 = vsel %vm506_vm2, %v503_v51, %v505_v55 }
 0x108   : > { %3015 = vmatpush1.bf16.msra.mxu0 %v3014_v53 }
 0x109   : > { %v3450_v60 = vpop.permute.xlu0 %3449  ;;  %601 = vmatprep.subr.mxu0 %v508_v56 }
 0x10a   : > { %v3452_v61 = vunpack.i.h.bf16 %v3450_v60  ;;  %v3451_v62 = vunpack.i.l.bf16 %v3450_v60  ;;  %v3455_v63 = vpop.permute.xlu1 %3454 }
 0x10b   : > { %v3456_v11 = vunpack.i.l.bf16 %v3455_v63  ;;  %v3457_v20 = vunpack.i.h.bf16 %v3455_v63 }
 0x10c   : > { %602 = vmatpush1.msra.mxu0 %v509_v5  ;;  %v431_v18 = vsel %vm427_vm4, %v3451_v62, %v3452_v61 }
 0x10d   : > { %v437_v13 = vpop.permute.xlu0 %436  ;;  %2959 = vmatmul.mubr.msk.f32.vlgmr.msra.gmra.mrb[4].mxu0 %vm513_vm3, %v4081_v38  ;;  %3017 = vmatprep.subr.bf16.mxu0 %v3016_v9  ;;  %v432_v21 = vsel %vm427_vm4, %v3456_v11, %v3451_v62  ;;  %v3020_v23 = vpack.c.bf16 %v431_v18, %v3977_v0  ;;  %v433_v30 = vsel %vm427_vm4, %v3457_v20, %v3456_v11 }
 0x10e   : > { %v4115_v15 = vpop.permute.xlu1 %438  ;;  %3019 = vmatpush1.bf16.msra.mxu0 %v3018_v10  ;;  %667 = vmatprep.mubr.f32.mxu0 %v4865_v8  ;;  %v3022_v27 = vpack.c.bf16 %v432_v21, %v3981_v2  ;;  %v3028_v37 = vpack.c.bf16 %v433_v30, %v3995_v7 }
 0x10f   : > { %678 = vmatprep.subr.mxu0 %v512_v17  ;;  %v450_v32 = vsel %vm446_vm5, %v437_v13, %v4115_v15 }
 0x111   : > { %v435_v22 = vpop.permute.xlu0 %434  ;;  %2960 = vmatmul.mubr.msk.f32.gmra.mrb[6].mxu0 %vm513_vm3, %v4087_v45 }
 0x112   : > { %v3460_v24 = vpop.permute.xlu1 %3459  ;;  %679 = vmatpush1.msra.mxu0 %v507_v19  ;;  %738 = vmatprep.mubr.f32.mxu0 %v4865_v8  ;;  %v451_v34 = vsel %vm446_vm5, %v435_v22, %v437_v13  ;;  %v989_v19 = vld [vmem:[#allocation5 + $0x20] sm:$0xff] }
 0x113   : > { %v3462_v25 = vunpack.i.h.bf16 %v3460_v24  ;;  %v3461_v26 = vunpack.i.l.bf16 %v3460_v24  ;;  %3021 = vmatprep.subr.bf16.mxu0 %v3020_v23 }
 0x115   : > { %v445_v28 = vpop.permute.xlu0 %444  ;;  %2961 = vmatmul.mubr.msk.f32.vlgmr.msra.gmra.mrb[8].mxu0 %vm513_vm3, %v4081_v38  ;;  %v429_v29 = vsel %vm427_vm4, %v3462_v25, %v3461_v26  ;;  %v430_v0 = vsel %vm427_vm4, %v3452_v61, %v3462_v25  ;;  %v428_v35 = vsel %vm427_vm4, %v3461_v26, %v3457_v20 }
 0x116   : > { %v443_v31 = vpop.permute.xlu1 %442  ;;  %3023 = vmatpush1.bf16.msra.mxu0 %v3022_v27  ;;  %v3024_v2 = vpack.c.bf16 %v429_v29, %v3985_v4  ;;  %744 = vmatprep.mubr.f32.mxu0 %v4865_v8  ;;  %v3026_v33 = vpack.c.bf16 %v430_v0, %v3979_v1  ;;  %v411_v1 = vld [vmem:[#allocation5] sm:$0xff]  ;;  %v3030_v42 = vpack.c.bf16 %v428_v35, %v3993_v6  ;;  %v990_v27 = vld [vmem:[#allocation5 + $0x28] sm:$0xff] }
 0x117   : > { %761 = vmatprep.subr.mxu0 %v450_v32  ;;  %v447_v49 = vsel %vm446_vm5, %v443_v31, %v445_v28 }
 0x118   : > { %3025 = vmatprep.subr.bf16.mxu1 %v3024_v2 }
 0x119   : > { %3027 = vmatpush1.bf16.msra.mxu1 %v3026_v33  ;;  %v3465_v36 = vpop.permute.xlu0 %3464  ;;  %2962 = vmatmul.mubr.msk.f32.gmra.mrb[10].mxu0 %vm513_vm3, %v4087_v45  ;;  %v452_v45 = vsel %vm446_vm5, %v445_v28, %v435_v22 }
 0x11a   : > { %v3467_v4 = vunpack.i.h.bf16 %v3465_v36  ;;  %v3466_v38 = vunpack.i.l.bf16 %v3465_v36  ;;  %v3470_v39 = vpop.permute.xlu1 %3469  ;;  %762 = vmatpush1.msra.mxu0 %v451_v34  ;;  %821 = vmatprep.mubr.f32.mxu0 %v4865_v8 }
 0x11b   : > { %v3472_v40 = vunpack.i.h.bf16 %v3470_v39  ;;  %v3471_v41 = vunpack.i.l.bf16 %v3470_v39  ;;  %3029 = vmatprep.subr.bf16.mxu0 %v3028_v37 }
 0x11c   : > { %v1007_v47 = vsel %vm1003_vm6, %v3466_v38, %v3467_v4 }
 0x11d   : > { %v4157_v43 = vpop.permute.xlu0 %3474  ;;  %2963 = vmatmul.mubr.msk.f32.vlgmr.msra.gmra.mrb[0].mxu0 %vm513_vm3, %v411_v1  ;;  %v1026_v6 = vsel %vm1022_vm7, %v3471_v41, %v3472_v40 }
 0x11e   : > { %v3476_v7 = vunpack.i.l.bf16 %v4157_v43  ;;  %v3480_v44 = vpop.permute.xlu1 %3479  ;;  %3031 = vmatpush1.bf16.msra.mxu0 %v3030_v42  ;;  %827 = vmatprep.mubr.f32.mxu0 %v4865_v8  ;;  %v3477_v50 = vunpack.i.h.bf16 %v4157_v43  ;;  %v3032_v55 = vpack.c.bf16 %v1026_v6, %v1007_v47 }
 0x11f   : > { %v3481_v48 = vunpack.i.l.bf16 %v3480_v44  ;;  %915 = vmatprep.subr.mxu0 %v452_v45  ;;  %v3482_v52 = vunpack.i.h.bf16 %v3480_v44 }
 0x120   : > { %v1008_v51 = vsel %vm1003_vm6, %v3476_v7, %v3466_v38  ;;  %v1006_v61 = vsel %vm1003_vm6, %v3467_v4, %v3477_v50 }
 0x121   : > { %v1027_v53 = vsel %vm1022_vm7, %v3481_v48, %v3471_v41  ;;  %v441_v54 = vpop.permute.xlu0 %440  ;;  %2964 = vmatmul.mubr.msk.f32.gmra.mrb[2].mxu0 %vm513_vm3, %v412_v46  ;;  %v1025_v62 = vsel %vm1022_vm7, %v3472_v40, %v3482_v52 }
 0x122   : > { %v3485_v56 = vpop.permute.xlu1 %3484  ;;  %916 = vmatpush1.msra.mxu0 %v447_v49  ;;  %v448_v57 = vsel %vm446_vm5, %v441_v54, %v443_v31  ;;  %v449_v58 = vsel %vm446_vm5, %v4115_v15, %v441_v54  ;;  %v3034_v60 = vpack.c.bf16 %v1027_v53, %v1008_v51  ;;  %975 = vmatprep.mubr.f32.mxu0 %v4865_v8 }
 0x123   : > { %v3486_v59 = vunpack.i.l.bf16 %v3485_v56  ;;  %3033 = vmatprep.subr.bf16.mxu0 %v3032_v55  ;;  %838 = vmatprep.subr.mxu1 %v448_v57  ;;  %v3038_v11 = vpack.c.bf16 %v1025_v62, %v1006_v61  ;;  %v3487_v15 = vunpack.i.h.bf16 %v3485_v56  ;;  %v1351_v55 = vld [vmem:[%s4855_s8] sm:$0x3f] }
 0x124   : > { %839 = vmatpush1.msra.mxu1 %v449_v58 }
 0x125   : > { %v1019_v63 = vpop.permute.xlu0 %1018  ;;  %2967 = vmatmul.mubr.msk.f32.vlgmr.msra.gmra.mrb[8].mxu0 %vm513_vm3, %v411_v1  ;;  %2965 = vmatmul.mubr.msk.f32.vlgmr.msra.gmra.mrb[0].mxu1 %vm513_vm3, %v411_v1  ;;  %v1005_v3 = vsel %vm1003_vm6, %v3477_v50, %v3486_v59  ;;  %v1004_v22 = vsel %vm1003_vm6, %v3486_v59, %v3487_v15  ;;  %v1009_v23 = vsel %vm1003_vm6, %v3487_v15, %v3476_v7  ;;  %v4236_v7 = vshrl.u32 %v425_v14, 7 }
 0x126   : > { %v1024_v5 = vsel %vm1022_vm7, %v3482_v52, %v1019_v63  ;;  %v1032_v9 = vpop.permute.xlu1 %1031  ;;  %3035 = vmatpush1.bf16.msra.mxu0 %v3034_v60  ;;  %981 = vmatprep.mubr.f32.mxu0 %v4865_v8 }
 0x127   : > { %v3036_v10 = vpack.c.bf16 %v1024_v5, %v1005_v3  ;;  %904 = vmatprep.mubr.f32.mxu1 %v4865_v8  ;;  %v1355_v52 = vsub.s32 0, %v4236_v7  ;;  %v1359_v58 = vsub.s32 1, %v4236_v7 }
 0x129   : > { %v1034_v13 = vpop.permute.xlu0 %1033  ;;  %2968 = vmatmul.mubr.msk.f32.gmra.mrb[10].mxu0 %vm513_vm3, %v412_v46  ;;  %3037 = vmatprep.subr.bf16.mxu1 %v3036_v10  ;;  %v1356_v62 = vrot.slane %v1351_v55, %v1355_v52 }
 0x12a   : > { %v1030_v17 = vpop.permute.xlu1 %1029  ;;  %3039 = vmatpush1.bf16.msra.mxu1 %v3038_v11  ;;  %v1045_v18 = vsel %vm1041_vm8, %v1032_v9, %v1034_v13  ;;  %1118 = vmatprep.mubr.f32.mxu0 %v4865_v8  ;;  %v1360_v11 = vrot.slane %v1351_v55, %v1359_v58 }
 0x12b   : > { %v1046_v20 = vsel %vm1041_vm8, %v1030_v17, %v1032_v9  ;;  %1058 = vmatprep.subr.mxu0 %v1045_v18  ;;  %2966 = vmatmul.mubr.msk.f32.gmra.mrb[2].mxu1 %vm513_vm3, %v412_v46  ;;  %v1375_v18 = vsub.s32 5, %v4236_v7 }
 0x12c   : > { %1059 = vmatpush1.msra.mxu0 %v1046_v20  ;;  %1195 = vmatprep.mubr.f32.mxu1 %v4865_v8 }
 0x12d   : > { %v1021_v21 = vpop.permute.xlu0 %1020  ;;  %2969 = vmatmul.mubr.msk.f32.vlgmr.msra.gmra.mrb[0].mxu0 %vm513_vm3, %v989_v19 }
 0x12e   : > { %v1023_v24 = vsel %vm1022_vm7, %v1019_v63, %v1021_v21  ;;  %v1028_v25 = vsel %vm1022_vm7, %v1021_v21, %v3481_v48  ;;  %v1036_v26 = vpop.permute.xlu1 %1035  ;;  %1124 = vmatprep.mubr.f32.mxu0 %v4865_v8 }
 0x12f   : > { %v3040_v28 = vpack.c.bf16 %v1028_v25, %v1009_v23  ;;  %v3042_v29 = vpack.c.bf16 %v1023_v24, %v1004_v22  ;;  %v1044_v32 = vsel %vm1041_vm8, %v1034_v13, %v1036_v26  ;;  %v1363_v13 = vsub.s32 2, %v4236_v7 }
 0x130   : > { %v1371_v23 = vsub.s32 4, %v4236_v7 }
 0x131   : > { %v1038_v0 = vpop.permute.xlu0 %1037  ;;  %3041 = vmatprep.subr.bf16.mxu0 %v3040_v28  ;;  %2970 = vmatmul.mubr.msk.f32.gmra.mrb[2].mxu0 %vm513_vm3, %v990_v27  ;;  %v1364_v22 = vrot.slane %v1351_v55, %v1363_v13 }
 0x132   : > { %v1040_v30 = vpop.permute.xlu1 %1039  ;;  %3043 = vmatpush1.bf16.msra.mxu0 %v3042_v29  ;;  %v1043_v31 = vsel %vm1041_vm8, %v1036_v26, %v1038_v0  ;;  %1272 = vmatprep.mubr.f32.mxu0 %v4865_v8  ;;  %v1367_v29 = vsub.s32 3, %v4236_v7 }
 0x133   : > { %1135 = vmatprep.subr.mxu1 %v1043_v31  ;;  %v1047_v2 = vsel %vm1041_vm8, %v1040_v30, %v1030_v17  ;;  %v1042_v33 = vsel %vm1041_vm8, %v1038_v0, %v1040_v30 }
 0x134   : > { %1212 = vmatprep.subr.mxu0 %v1047_v2  ;;  %1136 = vmatpush1.msra.mxu1 %v1044_v32  ;;  %v1376_v32 = vrot.slane %v1351_v55, %v1375_v18 }
 0x135   : > { %2971 = vmatmul.mubr.msk.f32.vlgmr.msra.gmra.mrb[0].mxu1 %vm513_vm3, %v989_v19 }
 0x136   : > { %1213 = vmatpush1.msra.mxu0 %v1042_v33  ;;  %1201 = vmatprep.mubr.f32.mxu1 %v4865_v8 }
 0x137   : > { %2973 = vmatmul.mubr.msk.f32.vlgmr.msra.gmra.mrb[8].mxu0 %vm513_vm3, %v989_v19 }
 0x138   : > { %1278 = vmatprep.mubr.f32.mxu0 %v4865_v8 }
 0x139   : > { %2972 = vmatmul.mubr.msk.f32.gmra.mrb[2].mxu1 %vm513_vm3, %v990_v27 }
 0x13a   : > { %1639 = vmatprep.mubr.f32.mxu1 %v4865_v8 }
 0x13b   : > { %2974 = vmatmul.mubr.msk.f32.gmra.mrb[10].mxu0 %vm513_vm3, %v990_v27 }
 0x13c   : > { %1568 = vmatprep.mubr.f32.mxu0 %v4865_v8 }
 0x142   : > { %v1302_v4 = vpop.permute.xlu0 %1301 }
 0x1e0   : > { %v663_v34 = vpop.f32.mrb[4].mxu0 }
 0x1e1   : > { %v665_v35 = vpop.f32.mrb[5].mxu0 }
 0x1e4   : > { %v4231_v36 = vpop.f32.mrb[6].mxu0 }
 0x1e5   : > { %v4233_v37 = vpop.f32.mrb[7].mxu0 }
 0x200   : > { %v1120_v38 = vpop.f32.mrb[0].mxu0 }
 0x201   : > { %v1309_v39 = vadd.f32 %v1302_v4, %v1120_v38  ;;  %v1122_v1 = vpop.f32.mrb[1].mxu0 }
 0x202   : > { %v1310_v40 = vadd.f32 %v1302_v4, %v1122_v1  ;;  %v1368_v1 = vrot.slane %v1351_v55, %v1367_v29 }
 0x203   : > { %v1327_v41 = vmul.f32 0.70710677, %v1309_v39  ;;  %v1321_v60 = vmul.f32 0.5, %v1309_v39 }
 0x204   : > { %v1328_v42 = vmul.f32 0.70710677, %v1310_v40  ;;  %v1322_v5 = vmul.f32 0.5, %v1310_v40 }
 0x205   : > { %3545 = verf.f32 %v1327_v41 }
 0x206   : > { %3547 = verf.f32 %v1328_v42 }
 0x208   : > { %v1197_v43 = vpop.f32.mrb[0].mxu1 }
 0x209   : > { %v3276_v44 = vadd.f32 %v1197_v43, %v663_v34  ;;  %v1199_v45 = vpop.f32.mrb[1].mxu1  ;;  %v1372_v34 = vrot.slane %v1351_v55, %v1371_v23  ;;  %v1298_v55 = vld [vmem:[%s4849_s2 + $0x8] sm:$0xff] }
 0x20a   : > { %v3277_v46 = vadd.f32 %v1199_v45, %v665_v35  ;;  %v1274_v47 = vpop.f32.mrb[8].mxu0 }
 0x20b   : > { %v1311_v6 = vadd.f32 %v3276_v44, %v1302_v4  ;;  %v1313_v48 = vadd.f32 %v1302_v4, %v1274_v47  ;;  %v1276_v49 = vpop.f32.mrb[9].mxu0 }
 0x20c   : > { %v1312_v50 = vadd.f32 %v3277_v46, %v1302_v4  ;;  %v1314_v51 = vadd.f32 %v1302_v4, %v1276_v49 }
 0x20d   : > { %v1329_v53 = vmul.f32 0.70710677, %v1311_v6  ;;  %v1331_v54 = vmul.f32 0.70710677, %v1313_v48  ;;  %v1323_v20 = vmul.f32 0.5, %v1311_v6  ;;  %v1325_v26 = vmul.f32 0.5, %v1313_v48 }
 0x20e   : > { %v1330_v56 = vmul.f32 0.70710677, %v1312_v50  ;;  %v1332_v14 = vmul.f32 0.70710677, %v1314_v51  ;;  %v1326_v30 = vmul.f32 0.5, %v1314_v51  ;;  %v1324_v35 = vmul.f32 0.5, %v1312_v50 }
 0x20f   : > { %v3546_v57 = vpop.eup %3545  ;;  %3549 = verf.f32 %v1329_v53 }
 0x210   : > { %v3548_v59 = vpop.eup %3547  ;;  %v1339_v61 = vadd.f32 1.0, %v3546_v57  ;;  %3551 = verf.f32 %v1330_v56  ;;  %v2211_v56 = vld [vmem:[%s4851_s4] sm:$0xff] }
 0x211   : > { %v1340_v63 = vadd.f32 1.0, %v3548_v59  ;;  %3553 = verf.f32 %v1331_v54 }
 0x212   : > { %v1345_v3 = vmul.f32 %v1339_v61, %v1321_v60  ;;  %3555 = verf.f32 %v1332_v14 }
 0x213   : > { %v1346_v9 = vmul.f32 %v1340_v63, %v1322_v5 }
 0x214   : > { %v1383_v10 = vmul.f32 %v1356_v62, %v1345_v3 }
 0x215   : > { %v1384_v15 = vmul.f32 %v1360_v11, %v1346_v9 }
 0x216   : > { %1389 = vrot.lane.b32.xlu1 %v1383_v10, %s3736_s23 }
 0x219   : > { %v3550_v17 = vpop.eup %3549 }
 0x21a   : > { %v3552_v19 = vpop.eup %3551  ;;  %v1341_v21 = vadd.f32 1.0, %v3550_v17  ;;  %1391 = vrot.lane.b32.xlu1 %v1384_v15, %s3736_s23 }
 0x21b   : > { %v3554_v24 = vpop.eup %3553  ;;  %v1342_v0 = vadd.f32 1.0, %v3552_v19 }
 0x21c   : > { %v3556_v25 = vpop.eup %3555  ;;  %v1343_v27 = vadd.f32 1.0, %v3554_v24  ;;  %v1347_v28 = vmul.f32 %v1341_v21, %v1323_v20 }
 0x21d   : > { %v1344_v31 = vadd.f32 1.0, %v3556_v25  ;;  %v1348_v39 = vmul.f32 %v1342_v0, %v1324_v35  ;;  %v4408_v35 = vld [vmem:[%s4850_s3 + $0x8] sm:$0xff] }
 0x21e   : > { %v1349_v2 = vmul.f32 %v1343_v27, %v1325_v26  ;;  %v1385_v33 = vmul.f32 %v1364_v22, %v1347_v28 }
 0x21f   : > { %v1350_v4 = vmul.f32 %v1344_v31, %v1326_v30  ;;  %v1386_v41 = vmul.f32 %v1368_v1, %v1348_v39 }
 0x220   : > { %1393 = vrot.lane.b32.xlu0 %v1385_v33, %s3736_s23  ;;  %v1387_v40 = vmul.f32 %v1372_v34, %v1349_v2 }
 0x221   : > { %v1388_v38 = vmul.f32 %v1376_v32, %v1350_v4 }
 0x223   : > { %1399 = vrot.lane.b32.xlu1 %v1388_v38, %s3736_s23 }
 0x224   : > { %1397 = vrot.lane.b32.xlu0 %v1387_v40, %s3736_s23 }
 0x227   : > { %1395 = vrot.lane.b32.xlu1 %v1386_v41, %s3736_s23 }
 0x288   : > { %v1390_v42 = vpop.permute.xlu1 %1389 }
 0x28c   : > { %v1392_v43 = vpop.permute.xlu1 %1391 }
 0x28d   : > { %v4256_v44 = vsel %vm1401_vm9, %v1390_v42, %v1392_v43 }
 0x292   : > { %v1394_v7 = vpop.permute.xlu0 %1393 }
 0x293   : > { %v4260_v45 = vsel %vm1401_vm9, %v1392_v43, %v1394_v7 }
 0x294   : > { %v3489_v46 = vpack.i.bf16 %v4260_v45, %v4256_v44 }
 0x295   : > { %v1400_v47 = vpop.permute.xlu1 %1399 }
 0x296   : > { %3490 = vrot.lane.b32.xlu0 %v3489_v46, %s3726_s19  ;;  %3495 = vrot.lane.b32.xlu1 %v3489_v46, %s3727_s21  ;;  %v1398_v6 = vpop.permute.xlu0 %1397  ;;  %v4287_v51 = vsel %vm1401_vm9, %v1400_v47, %v1390_v42 }
 0x297   : > { %v4279_v50 = vsel %vm1401_vm9, %v1398_v6, %v1400_v47 }
 0x298   : > { %v3509_v52 = vpack.i.bf16 %v4279_v50, %v4287_v51 }
 0x299   : > { %v1396_v48 = vpop.permute.xlu1 %1395 }
 0x29a   : > { %1485 = vrot.lane.b32.xlu0 %v4256_v44, %s3729_s22  ;;  %1487 = vrot.lane.b32.xlu1 %v4260_v45, %s3729_s22  ;;  %v4272_v49 = vsel %vm1401_vm9, %v1396_v48, %v1398_v6  ;;  %v4324_v53 = vsel %vm1401_vm9, %v1394_v7, %v1396_v48 }
 0x29b   : > { %v3529_v54 = vpack.i.bf16 %v4272_v49, %v4324_v53 }
 0x29e   : > { %3500 = vrot.lane.b32.xlu1 %v3489_v46, %s3730_s20  ;;  %1455 = vrot.lane.b32.xlu0 %v4272_v49, %s3726_s19 }
 0x2a2   : > { %1473 = vrot.lane.b32.xlu1 %v4272_v49, %s3727_s21  ;;  %1491 = vrot.lane.b32.xlu0 %v4272_v49, %s3729_s22 }
 0x2a6   : > { %3510 = vrot.lane.b32.xlu1 %v3509_v52, %s3727_s21  ;;  %3505 = vrot.lane.b32.xlu0 %v3509_v52, %s3726_s19 }
 0x2aa   : > { %1429 = vrot.lane.b32.xlu1 %v4256_v44, %s3731_s27  ;;  %1431 = vrot.lane.b32.xlu0 %v4260_v45, %s3731_s27 }
 0x2ae   : > { %1417 = vrot.lane.b32.xlu1 %v4272_v49, %s3730_s20  ;;  %1483 = vrot.lane.b32.xlu0 %v4287_v51, %s3729_s22 }
 0x2b2   : > { %3520 = vrot.lane.b32.xlu1 %v3509_v52, %s3730_s20  ;;  %1493 = vrot.lane.b32.xlu0 %v4279_v50, %s3729_s22 }
 0x2b6   : > { %3525 = vrot.lane.b32.xlu1 %v3489_v46, %s3733_s13  ;;  %3515 = vrot.lane.b32.xlu0 %v3489_v46, %s3732_s29 }
 0x2ba   : > { %1437 = vrot.lane.b32.xlu1 %v4279_v50, %s3731_s27  ;;  %1427 = vrot.lane.b32.xlu0 %v4287_v51, %s3731_s27 }
 0x2be   : > { %1935 = vrot.lane.b32.xlu1 %v4287_v51, %s3732_s29  ;;  %1435 = vrot.lane.b32.xlu0 %v4272_v49, %s3731_s27 }
 0x2c2   : > { %1973 = vrot.lane.b32.xlu1 %v4256_v44, %s3734_s24  ;;  %1953 = vrot.lane.b32.xlu0 %v4287_v51, %s3733_s13 }
 0x2c6   : > { %1971 = vrot.lane.b32.xlu1 %v4287_v51, %s3734_s24  ;;  %1975 = vrot.lane.b32.xlu0 %v4260_v45, %s3734_s24 }
 0x2ca   : > { %1471 = vrot.lane.b32.xlu1 %v4324_v53, %s3727_s21  ;;  %1453 = vrot.lane.b32.xlu0 %v4324_v53, %s3726_s19 }
 0x2ce   : > { %1415 = vrot.lane.b32.xlu1 %v4324_v53, %s3730_s20  ;;  %1489 = vrot.lane.b32.xlu0 %v4324_v53, %s3729_s22  ;;  %s2956_s22 = sshll.u32 %s3965_s9, 5  ;;  %s2993_s20 = sshll.u32 %s3817_s17, 9 }
 0x2cf   : > { %s4803_s18 = scalar_lea.hbm %s4857_s10, %s2993_s20  ;;  %s2844_s17 = scalar_lea.sflag [#allocation4], %s3965_s9 }
 0x2d2   : > { %3530 = vrot.lane.b32.xlu1 %v3529_v54, %s3732_s29  ;;  %1433 = vrot.lane.b32.xlu0 %v4324_v53, %s3731_s27  ;;  %s404_s27 = scalar_lea.vmem [#allocation8], %s2956_s22 }
 0x2d6   : > { %1977 = vrot.lane.b32.xlu1 %v4324_v53, %s3734_s24  ;;  %3535 = vrot.lane.b32.xlu0 %v3529_v54, %s3733_s13 }
 0x2da   : > { %1306 = vperm.xlu1 %3539, %v1298_v55   ;;  %1979 = vrot.lane.b32.xlu0 %v4272_v49, %s3734_s24 }
 0x2de   : > { %1945 = vrot.lane.b32.xlu1 %v4279_v50, %s3732_s29  ;;  %2214 = vperm.xlu0 %3488, %v2211_v56   ;;  %s2858_s29 = sshll.u32 %s404_s27, 4  ;;  %s4805_s29 = int_to_ptr.vmem [resolvable:$true] %s2858_s29 }
 0x2df   : > { %s3647_s25 = scalar_lea.vmem %s4805_s29, 512 }
 0x2e0   : > { %p3648_p8 = scmp.ne.s32.totalorder %s4805_s29, %s3647_s25 }
 0x2e2   : > { %1981 = vrot.lane.b32.xlu1 %v4279_v50, %s3734_s24  ;;  %1963 = vrot.lane.b32.xlu0 %v4279_v50, %s3733_s13  ;;  %p3649_p1 = pnand %p3648_p8, %p4888_p0 }
 0x2e4   : > { %p3650_p3 = pneg %p3649_p1 }
 0x308   : > { %v4356_v14 = vpop.permute.xlu0 %3490  ;;  %v4358_v57 = vpop.permute.xlu1 %3495 }
 0x309   : > { %v3493_v58 = vunpack.i.h.bf16 %v4356_v14  ;;  %v3492_v59 = vunpack.i.l.bf16 %v4356_v14  ;;  %v3498_v60 = vunpack.i.h.bf16 %v4358_v57  ;;  %v3497_v61 = vunpack.i.l.bf16 %v4358_v57 }
 0x30b   : > { %v1462_v62 = vsel %vm468_vm0, %v3492_v59, %v3493_v58  ;;  %v1480_v63 = vsel %vm487_vm1, %v3497_v61, %v3498_v60 }
 0x30c   : > { %v1486_v3 = vpop.permute.xlu0 %1485  ;;  %v4372_v5 = vpop.permute.xlu1 %1487  ;;  %v3044_v9 = vpack.c.bf16 %v1480_v63, %v1462_v62 }
 0x30d   : > { %v1498_v28 = vsel %vm506_vm2, %v1486_v3, %v4372_v5 }
 0x30e   : > { %3045 = vmatprep.subr.bf16.mxu0 %v3044_v9  ;;  %v4450_v9 = vld [vmem:[%s4850_s3] sm:$0xff] }
 0x310   : > { %v4374_v10 = vpop.permute.xlu0 %1455  ;;  %v4376_v11 = vpop.permute.xlu1 %3500 }
 0x311   : > { %v3503_v32 = vunpack.i.h.bf16 %v4376_v11  ;;  %v3502_v2 = vunpack.i.l.bf16 %v4376_v11 }
 0x313   : > { %v1424_v41 = vsel %vm427_vm4, %v3502_v2, %v3503_v32 }
 0x314   : > { %v4378_v13 = vpop.permute.xlu0 %1491  ;;  %v4380_v15 = vpop.permute.xlu1 %1473  ;;  %v3056_v6 = vpack.c.bf16 %v1424_v41, %v4256_v44 }
 0x318   : > { %v3506_v17 = vpop.permute.xlu0 %3505  ;;  %v3511_v18 = vpop.permute.xlu1 %3510 }
 0x319   : > { %v3507_v19 = vunpack.i.l.bf16 %v3506_v17  ;;  %v3512_v20 = vunpack.i.l.bf16 %v3511_v18  ;;  %v3508_v21 = vunpack.i.h.bf16 %v3506_v17  ;;  %v3513_v22 = vunpack.i.h.bf16 %v3511_v18 }
 0x31b   : > { %v1463_v23 = vsel %vm468_vm0, %v3507_v19, %v3492_v59  ;;  %v1481_v24 = vsel %vm487_vm1, %v3512_v20, %v3497_v61  ;;  %v1464_v29 = vsel %vm468_vm0, %v3508_v21, %v3507_v19  ;;  %v1482_v0 = vsel %vm487_vm1, %v3513_v22, %v3512_v20 }
 0x31c   : > { %v3046_v25 = vpack.c.bf16 %v1481_v24, %v1463_v23  ;;  %v4386_v26 = vpop.permute.xlu0 %1431  ;;  %v1430_v27 = vpop.permute.xlu1 %1429  ;;  %v1459_v30 = vsel %vm468_vm0, %v4374_v10, %v3508_v21  ;;  %v1477_v31 = vsel %vm487_vm1, %v4380_v15, %v3513_v22  ;;  %v3052_v38 = vpack.c.bf16 %v1482_v0, %v1464_v29 }
 0x31d   : > { %v3054_v39 = vpack.c.bf16 %v1477_v31, %v1459_v30  ;;  %v1442_v55 = vsel %vm446_vm5, %v1430_v27, %v4386_v26 }
 0x31e   : > { %3047 = vmatpush1.bf16.msra.mxu0 %v3046_v25 }
 0x31f   : > { %1508 = vmatprep.subr.mxu0 %v1498_v28 }
 0x320   : > { %v1484_v33 = vpop.permute.xlu0 %1483  ;;  %v4403_v34 = vpop.permute.xlu1 %1417 }
 0x321   : > { %v1499_v4 = vsel %vm506_vm2, %v1484_v33, %v1486_v3 }
 0x322   : > { %1509 = vmatpush1.msra.mxu0 %v1499_v4 }
 0x323   : > { %3053 = vmatprep.subr.bf16.mxu0 %v3052_v38  ;;  %2976 = vmatmul.mubr.msk.f32.vlgmr.msra.gmra.mrb[2].mxu0 %vm513_vm3, %v4408_v35 }
 0x324   : > { %v1494_v1 = vpop.permute.xlu0 %1493  ;;  %v3521_v40 = vpop.permute.xlu1 %3520  ;;  %3055 = vmatpush1.bf16.msra.mxu0 %v3054_v39  ;;  %1710 = vmatprep.mubr.f32.mxu0 %v4865_v8 }
 0x325   : > { %v3522_v42 = vunpack.i.l.bf16 %v3521_v40  ;;  %v1500_v43 = vsel %vm506_vm2, %v1494_v1, %v1484_v33  ;;  %v3523_v7 = vunpack.i.h.bf16 %v3521_v40  ;;  %v1495_v46 = vsel %vm506_vm2, %v4378_v13, %v1494_v1  ;;  %v4494_v33 = vld [vmem:[%s4850_s3 + $0x10] sm:$0xff] }
 0x326   : > { %1650 = vmatprep.subr.mxu0 %v1500_v43 }
 0x327   : > { %v1425_v47 = vsel %vm427_vm4, %v3522_v42, %v3502_v2  ;;  %v1426_v44 = vsel %vm427_vm4, %v3523_v7, %v3522_v42 }
 0x328   : > { %v3058_v48 = vpack.c.bf16 %v1425_v47, %v4287_v51  ;;  %v4428_v52 = vpop.permute.xlu0 %3515  ;;  %v4430_v54 = vpop.permute.xlu1 %3525  ;;  %1651 = vmatpush1.msra.mxu0 %v1495_v46  ;;  %v1421_v51 = vsel %vm427_vm4, %v4403_v34, %v3523_v7  ;;  %v3064_v18 = vpack.c.bf16 %v1426_v44, %v4279_v50 }
 0x329   : > { %3057 = vmatprep.subr.bf16.mxu0 %v3056_v6  ;;  %2978 = vmatmul.mubr.msk.f32.vlgmr.msra.gmra.mrb[10].mxu0 %vm513_vm3, %v4408_v35  ;;  %v3518_v56 = vunpack.i.h.bf16 %v4428_v52  ;;  %v3517_v59 = vunpack.i.l.bf16 %v4428_v52  ;;  %v3528_v61 = vunpack.i.h.bf16 %v4430_v54  ;;  %v3527_v62 = vunpack.i.l.bf16 %v4430_v54  ;;  %v2235_v54 = vld [vmem:[#allocation7 + $0x18] sm:$0xff] }
 0x32a   : > { %3059 = vmatpush1.bf16.msra.mxu0 %v3058_v48  ;;  %1784 = vmatprep.mubr.f32.mxu0 %v4865_v8  ;;  %v3066_v19 = vpack.c.bf16 %v1421_v51, %v4272_v49 }
 0x32b   : > { %1724 = vmatprep.subr.mxu0 %v1442_v55  ;;  %v1950_v23 = vsel %vm1003_vm6, %v3517_v59, %v3518_v56  ;;  %v1968_v49 = vsel %vm1022_vm7, %v3527_v62, %v3528_v61 }
 0x32c   : > { %v1428_v63 = vpop.permute.xlu0 %1427  ;;  %v1438_v3 = vpop.permute.xlu1 %1437  ;;  %v3068_v24 = vpack.c.bf16 %v1968_v49, %v1950_v23  ;;  %v2236_v23 = vld [vmem:[#allocation7 + $0x20] sm:$0xff]  ;;  %v2238_v49 = vld [vmem:[#allocation7 + $0x30] sm:$0xff] }
 0x32d   : > { %v1443_v17 = vsel %vm446_vm5, %v1428_v63, %v1430_v27  ;;  %v1444_v22 = vsel %vm446_vm5, %v1438_v3, %v1428_v63 }
 0x32e   : > { %1725 = vmatpush1.msra.mxu0 %v1443_v17  ;;  %v2234_v17 = vld [vmem:[#allocation7 + $0x10] sm:$0xff] }
 0x32f   : > { %3065 = vmatprep.subr.bf16.mxu0 %v3064_v18  ;;  %2979 = vmatmul.mubr.msk.f32.vlgmr.msra.gmra.mrb[2].mxu0 %vm513_vm3, %v4450_v9  ;;  %v2237_v18 = vld [vmem:[#allocation7 + $0x28] sm:$0xff] }
 0x330   : > { %v1436_v20 = vpop.permute.xlu0 %1435  ;;  %v4458_v21 = vpop.permute.xlu1 %1935  ;;  %3067 = vmatpush1.bf16.msra.mxu0 %v3066_v19  ;;  %1926 = vmatprep.mubr.f32.mxu0 %v4865_v8  ;;  %v2239_v19 = vld [vmem:[#allocation7 + $0x38] sm:$0xff] }
 0x331   : > { %1866 = vmatprep.subr.mxu0 %v1444_v22  ;;  %v1439_v50 = vsel %vm446_vm5, %v1436_v20, %v1438_v3  ;;  %v1951_v28 = vsel %vm1003_vm6, %v4458_v21, %v3517_v59  ;;  %v2233_v59 = vld [vmem:[#allocation7 + $0x8] sm:$0xff]  ;;  %v2232_v3 = vld [vmem:[#allocation7] sm:$0xff]  ;;  %v4579_v22 = vpack.c.bf16 %v2239_v19, %v2237_v18 }
 0x332   : > { %v4571_v63 = vpack.c.bf16 %v2235_v54, %v2233_v59  ;;  %v2261_v54 = vld [vmem:[#allocation7 + $0xe8] sm:$0xff]  ;;  %v2264_v19 = vld [vmem:[#allocation7 + $0x100] sm:$0xff] }
 0x334   : > { %v4473_v25 = vpop.permute.xlu0 %1953  ;;  %v1974_v27 = vpop.permute.xlu1 %1973  ;;  %1867 = vmatpush1.msra.mxu0 %v1439_v50  ;;  %v2241_v50 = vld [vmem:[#allocation7 + $0x48] sm:$0xff] }
 0x335   : > { %v1969_v29 = vsel %vm1022_vm7, %v4473_v25, %v3527_v62  ;;  %3069 = vmatprep.subr.bf16.mxu0 %v3068_v24  ;;  %2981 = vmatmul.mubr.msk.f32.vlgmr.msra.gmra.mrb[10].mxu0 %vm513_vm3, %v4450_v9  ;;  %v2243_v24 = vld [vmem:[#allocation7 + $0x58] sm:$0xff] }
 0x336   : > { %v3070_v0 = vpack.c.bf16 %v1969_v29, %v1951_v28  ;;  %2056 = vmatprep.mubr.f32.mxu0 %v4865_v8  ;;  %v4587_v28 = vpack.c.bf16 %v2243_v24, %v2241_v50  ;;  %v2240_v29 = vld [vmem:[#allocation7 + $0x40] sm:$0xff] }
 0x338   : > { %v4484_v30 = vpop.permute.xlu0 %1975  ;;  %v4486_v31 = vpop.permute.xlu1 %1971  ;;  %3071 = vmatpush1.bf16.msra.mxu0 %v3070_v0  ;;  %v2242_v0 = vld [vmem:[#allocation7 + $0x50] sm:$0xff] }
 0x339   : > { %v1986_v2 = vsel %vm1041_vm8, %v1974_v27, %v4484_v30  ;;  %v1987_v4 = vsel %vm1041_vm8, %v4486_v31, %v1974_v27  ;;  %v4584_v27 = vpack.c.bf16 %v2238_v49, %v2236_v23  ;;  %v2269_v23 = vld [vmem:[#allocation7 + $0x128] sm:$0xff]  ;;  %v2271_v49 = vld [vmem:[#allocation7 + $0x138] sm:$0xff] }
 0x33a   : > { %1996 = vmatprep.subr.mxu0 %v1986_v2  ;;  %v2245_v2 = vld [vmem:[#allocation7 + $0x68] sm:$0xff]  ;;  %v4656_v24 = vpack.c.bf16 %v2271_v49, %v2269_v23  ;;  %v2294_v23 = vld [vmem:[#allocation7 + $0x1f0] sm:$0xff] }
 0x33c   : > { %v1454_v38 = vpop.permute.xlu0 %1453  ;;  %v1472_v39 = vpop.permute.xlu1 %1471  ;;  %1997 = vmatpush1.msra.mxu0 %v1987_v4  ;;  %v2247_v4 = vld [vmem:[#allocation7 + $0x78] sm:$0xff] }
 0x33d   : > { %v1460_v1 = vsel %vm468_vm0, %v1454_v38, %v4374_v10  ;;  %v1461_v40 = vsel %vm468_vm0, %v3493_v58, %v1454_v38  ;;  %v1478_v41 = vsel %vm487_vm1, %v1472_v39, %v4380_v15  ;;  %v1479_v42 = vsel %vm487_vm1, %v3498_v60, %v1472_v39  ;;  %2983 = vmatmul.mubr.msk.f32.vlgmr.msra.gmra.mrb[2].mxu0 %vm513_vm3, %v4494_v33 }
 0x33e   : > { %v3048_v43 = vpack.c.bf16 %v1478_v41, %v1460_v1  ;;  %v3050_v7 = vpack.c.bf16 %v1479_v42, %v1461_v40  ;;  %2198 = vmatprep.mubr.f32.mxu0 %v4865_v8  ;;  %v4592_v38 = vpack.c.bf16 %v2242_v0, %v2240_v29  ;;  %v4595_v39 = vpack.c.bf16 %v2247_v4, %v2245_v2  ;;  %v2244_v1 = vld [vmem:[#allocation7 + $0x60] sm:$0xff]  ;;  %v2246_v40 = vld [vmem:[#allocation7 + $0x70] sm:$0xff]  ;;  %v2273_v2 = vld [vmem:[#allocation7 + $0x148] sm:$0xff] }
 0x33f   : > { %v2268_v29 = vld [vmem:[#allocation7 + $0x120] sm:$0xff]  ;;  %v2270_v0 = vld [vmem:[#allocation7 + $0x130] sm:$0xff]  ;;  %v2275_v4 = vld [vmem:[#allocation7 + $0x158] sm:$0xff] }
 0x340   : > { %v1490_v14 = vpop.permute.xlu0 %1489  ;;  %3049 = vmatprep.subr.bf16.mxu1 %v3048_v43  ;;  %v1416_v10 = vpop.permute.xlu1 %1415  ;;  %v2249_v43 = vld [vmem:[#allocation7 + $0x88] sm:$0xff] }
 0x341   : > { %v1422_v58 = vsel %vm427_vm4, %v1416_v10, %v4403_v34  ;;  %3051 = vmatpush1.bf16.msra.mxu1 %v3050_v7  ;;  %v1496_v57 = vsel %vm506_vm2, %v1490_v14, %v4378_v13  ;;  %v1423_v60 = vsel %vm427_vm4, %v3503_v32, %v1416_v10  ;;  %v1497_v15 = vsel %vm506_vm2, %v4372_v5, %v1490_v14  ;;  %v2251_v7 = vld [vmem:[#allocation7 + $0x98] sm:$0xff] }
 0x342   : > { %1579 = vmatprep.subr.mxu1 %v1496_v57  ;;  %v3060_v46 = vpack.c.bf16 %v1422_v58, %v4324_v53  ;;  %v3062_v34 = vpack.c.bf16 %v1423_v60, %v4260_v45  ;;  %v4600_v14 = vpack.c.bf16 %v2246_v40, %v2244_v1  ;;  %v4603_v10 = vpack.c.bf16 %v2251_v7, %v2249_v43  ;;  %v2248_v58 = vld [vmem:[#allocation7 + $0x80] sm:$0xff]  ;;  %v2250_v57 = vld [vmem:[#allocation7 + $0x90] sm:$0xff]  ;;  %v2277_v7 = vld [vmem:[#allocation7 + $0x168] sm:$0xff] }
 0x343   : > { %v4659_v1 = vpack.c.bf16 %v2270_v0, %v2268_v29  ;;  %v4662_v40 = vpack.c.bf16 %v2275_v4, %v2273_v2  ;;  %v2274_v43 = vld [vmem:[#allocation7 + $0x150] sm:$0xff]  ;;  %v2297_v29 = vld [vmem:[#allocation7 + $0x208] sm:$0xff]  ;;  %v2299_v0 = vld [vmem:[#allocation7 + $0x218] sm:$0xff] }
 0x344   : > { %v1434_v47 = vpop.permute.xlu0 %1433  ;;  %v4530_v6 = vpop.permute.xlu1 %3530  ;;  %v4699_v2 = vpack.c.bf16 %v2299_v0, %v2297_v29  ;;  %v2308_v0 = vld [vmem:[#allocation7 + $0x260] sm:$0xff] }
 0x345   : > { %1580 = vmatpush1.msra.mxu1 %v1497_v15  ;;  %v3533_v11 = vunpack.i.h.bf16 %v4530_v6  ;;  %v3532_v13 = vunpack.i.l.bf16 %v4530_v6  ;;  %v1440_v5 = vsel %vm446_vm5, %v1434_v47, %v1436_v20  ;;  %v2253_v15 = vld [vmem:[#allocation7 + $0xa8] sm:$0xff]  ;;  %v4620_v6 = vpack.c.bf16 %v2250_v57, %v2248_v58  ;;  %v2279_v58 = vld [vmem:[#allocation7 + $0x178] sm:$0xff] }
 0x346   : > { %2977 = vmatmul.mubr.msk.f32.vlgmr.msra.gmra.mrb[2].mxu1 %vm513_vm3, %v4408_v35  ;;  %3061 = vmatprep.subr.bf16.mxu1 %v3060_v46  ;;  %v1441_v35 = vsel %vm446_vm5, %v4386_v26, %v1434_v47  ;;  %v2255_v46 = vld [vmem:[#allocation7 + $0xb8] sm:$0xff] }
 0x347   : > { %3063 = vmatpush1.bf16.msra.mxu1 %v3062_v34  ;;  %1855 = vmatprep.mubr.f32.mxu1 %v4865_v8  ;;  %v1949_v48 = vsel %vm1003_vm6, %v3518_v56, %v3532_v13  ;;  %v1948_v44 = vsel %vm1003_vm6, %v3532_v13, %v3533_v11 }
 0x348   : > { %v4540_v53 = vpop.permute.xlu0 %3535  ;;  %1795 = vmatprep.subr.mxu1 %v1440_v5  ;;  %v1978_v62 = vpop.permute.xlu1 %1977 }
 0x349   : > { %v3538_v45 = vunpack.i.h.bf16 %v4540_v53  ;;  %v3537_v32 = vunpack.i.l.bf16 %v4540_v53  ;;  %v1985_v20 = vsel %vm1041_vm8, %v4484_v30, %v1978_v62  ;;  %v2254_v53 = vld [vmem:[#allocation7 + $0xb0] sm:$0xff] }
 0x34b   : > { %v1967_v55 = vsel %vm1022_vm7, %v3528_v61, %v3537_v32  ;;  %1796 = vmatpush1.msra.mxu1 %v1441_v35  ;;  %v1966_v26 = vsel %vm1022_vm7, %v3537_v32, %v3538_v45 }
 0x34c   : > { %v3074_v52 = vpack.c.bf16 %v1967_v55, %v1949_v48  ;;  %v4563_v51 = vpop.permute.xlu0 %1979  ;;  %v3072_v56 = vpack.c.bf16 %v1966_v26, %v1948_v44  ;;  %v2257_v55 = vld [vmem:[#allocation7 + $0xc8] sm:$0xff] }
 0x34d   : > { %v1984_v61 = vsel %vm1041_vm8, %v1978_v62, %v4563_v51  ;;  %v2263_v62 = vld [vmem:[#allocation7 + $0xf8] sm:$0xff] }
 0x34e   : > { %2980 = vmatmul.mubr.msk.f32.vlgmr.msra.gmra.mrb[2].mxu1 %vm513_vm3, %v4450_v9  ;;  %3073 = vmatprep.subr.bf16.mxu1 %v3072_v56  ;;  %v4576_v9 = vpack.c.bf16 %v2234_v17, %v2232_v3  ;;  %v2258_v56 = vld [vmem:[#allocation7 + $0xd0] sm:$0xff]  ;;  %v2260_v3 = vld [vmem:[#allocation7 + $0xe0] sm:$0xff] }
 0x34f   : > { %3075 = vmatpush1.bf16.msra.mxu1 %v3074_v52  ;;  %2127 = vmatprep.mubr.f32.mxu1 %v4865_v8  ;;  %v2256_v52 = vld [vmem:[#allocation7 + $0xc0] sm:$0xff]  ;;  %v2262_v17 = vld [vmem:[#allocation7 + $0xf0] sm:$0xff] }
 0x350   : > { %2067 = vmatprep.subr.mxu1 %v1984_v61  ;;  %v4643_v61 = vpack.c.bf16 %v2263_v62, %v2261_v54  ;;  %v4647_v18 = vpack.c.bf16 %v2262_v17, %v2260_v3  ;;  %v2288_v62 = vld [vmem:[#allocation7 + $0x1c0] sm:$0xff]  ;;  %v2290_v3 = vld [vmem:[#allocation7 + $0x1d0] sm:$0xff] }
 0x351   : > { %v4689_v17 = vpack.c.bf16 %v2290_v3, %v2288_v62  ;;  %v2304_v3 = vld [vmem:[#allocation7 + $0x240] sm:$0xff] }
 0x353   : > { %2068 = vmatpush1.msra.mxu1 %v1985_v20  ;;  %v2266_v20 = vld [vmem:[#allocation7 + $0x110] sm:$0xff] }
 0x354   : > { %3081 = vmatprep.subr.bf16.mxu1 %v4571_v63  ;;  %v4653_v50 = vpack.c.bf16 %v2266_v20, %v2264_v19  ;;  %v2292_v20 = vld [vmem:[#allocation7 + $0x1e0] sm:$0xff] }
 0x355   : > { %v4695_v49 = vpack.c.bf16 %v2294_v23, %v2292_v20  ;;  %v2311_v20 = vld [vmem:[#allocation7 + $0x278] sm:$0xff] }
 0x356   : > { %2984 = vmatmul.mubr.msk.f32.vlgmr.msra.gmra.mrb[2].mxu1 %vm513_vm3, %v4494_v33 }
 0x357   : > { %3083 = vmatpush1.bf16.msra.mxu1 %v4576_v9  ;;  %4884 = vst [vmem:[#allocation14_spill] sm:$0xff] %v4695_v49 }
 0x358   : > { %3085 = vmatprep.subr.bf16.mxu1 %v4579_v22 }
 0x359   : > { %v4589_v30 = vpop.permute.xlu1 %1306 }
 0x35b   : > { %3087 = vmatpush1.bf16.msra.mxu1 %v4584_v27 }
 0x35c   : > { %3089 = vmatprep.subr.bf16.mxu1 %v4587_v28 }
 0x35d   : > { %v4597_v41 = vpop.permute.xlu0 %2214  ;;  %v1946_v42 = vpop.permute.xlu1 %1945 }
 0x35e   : > { %v1947_v47 = vsel %vm1003_vm6, %v3533_v11, %v1946_v42  ;;  %v1952_v34 = vsel %vm1003_vm6, %v1946_v42, %v4458_v21  ;;  %v4623_v11 = vpack.c.bf16 %v2255_v46, %v2253_v15  ;;  %v2252_v21 = vld [vmem:[#allocation7 + $0xa0] sm:$0xff]  ;;  %v2278_v46 = vld [vmem:[#allocation7 + $0x170] sm:$0xff] }
 0x35f   : > { %3091 = vmatpush1.bf16.msra.mxu1 %v4592_v38  ;;  %v4629_v44 = vpack.c.bf16 %v2254_v53, %v2252_v21  ;;  %v2272_v42 = vld [vmem:[#allocation7 + $0x140] sm:$0xff]  ;;  %v2287_v21 = vld [vmem:[#allocation7 + $0x1b8] sm:$0xff] }
 0x360   : > { %3093 = vmatprep.subr.bf16.mxu1 %v4595_v39  ;;  %v4665_v57 = vpack.c.bf16 %v2274_v43, %v2272_v42  ;;  %v2276_v15 = vld [vmem:[#allocation7 + $0x160] sm:$0xff] }
 0x361   : > { %v1964_v60 = vpop.permute.xlu0 %1963  ;;  %v1982_v48 = vpop.permute.xlu1 %1981 }
 0x362   : > { %v1965_v13 = vsel %vm1022_vm7, %v3538_v45, %v1964_v60  ;;  %v1970_v5 = vsel %vm1022_vm7, %v1964_v60, %v4473_v25  ;;  %v2259_v45 = vld [vmem:[#allocation7 + $0xd8] sm:$0xff]  ;;  %v1988_v25 = vsel %vm1041_vm8, %v1982_v48, %v4486_v31  ;;  %v1983_v59 = vsel %vm1041_vm8, %v4563_v51, %v1982_v48  ;;  %v2285_v48 = vld [vmem:[#allocation7 + $0x1a8] sm:$0xff] }
 0x363   : > { %v3076_v32 = vpack.c.bf16 %v1970_v5, %v1952_v34  ;;  %v3078_v35 = vpack.c.bf16 %v1965_v13, %v1947_v47  ;;  %3095 = vmatpush1.bf16.msra.mxu1 %v4600_v14  ;;  %v4632_v26 = vpack.c.bf16 %v2259_v45, %v2257_v55  ;;  %v4640_v31 = vpack.c.bf16 %v2258_v56, %v2256_v52  ;;  %v2267_v51 = vld [vmem:[#allocation7 + $0x118] sm:$0xff]  ;;  %v2281_v47 = vld [vmem:[#allocation7 + $0x188] sm:$0xff]  ;;  %v2284_v45 = vld [vmem:[#allocation7 + $0x1a0] sm:$0xff] }
 0x364   : > { %3097 = vmatprep.subr.bf16.mxu1 %v4603_v10  ;;  %v4668_v60 = vpack.c.bf16 %v2279_v58, %v2277_v7  ;;  %v2283_v34 = vld [vmem:[#allocation7 + $0x198] sm:$0xff]  ;;  %v4671_v13 = vpack.c.bf16 %v2278_v46, %v2276_v15  ;;  %v4680_v55 = vpack.c.bf16 %v2287_v21, %v2285_v48  ;;  %v2289_v52 = vld [vmem:[#allocation7 + $0x1c8] sm:$0xff]  ;;  %v2296_v7 = vld [vmem:[#allocation7 + $0x200] sm:$0xff] }
 0x365   : > { %3077 = vmatprep.subr.bf16.mxu0 %v3076_v32  ;;  %v4674_v5 = vpack.c.bf16 %v2283_v34, %v2281_v47  ;;  %v2280_v32 = vld [vmem:[#allocation7 + $0x180] sm:$0xff]  ;;  %v2291_v56 = vld [vmem:[#allocation7 + $0x1d8] sm:$0xff]  ;;  %v2298_v58 = vld [vmem:[#allocation7 + $0x210] sm:$0xff] }
 0x366   : > { %3079 = vmatpush1.bf16.msra.mxu0 %v3078_v35  ;;  %v2282_v35 = vld [vmem:[#allocation7 + $0x190] sm:$0xff]  ;;  %v4686_v54 = vpack.c.bf16 %v2291_v56, %v2289_v52  ;;  %v2301_v46 = vld [vmem:[#allocation7 + $0x228] sm:$0xff]  ;;  %v2303_v47 = vld [vmem:[#allocation7 + $0x238] sm:$0xff] }
 0x367   : > { %2138 = vmatprep.subr.mxu0 %v1988_v25  ;;  %3099 = vmatpush1.bf16.msra.mxu1 %v4620_v6  ;;  %v4677_v53 = vpack.c.bf16 %v2282_v35, %v2280_v32  ;;  %v2286_v25 = vld [vmem:[#allocation7 + $0x1b0] sm:$0xff]  ;;  %v4705_v32 = vpack.c.bf16 %v2298_v58, %v2296_v7  ;;  %v4708_v48 = vpack.c.bf16 %v2303_v47, %v2301_v46  ;;  %v2300_v21 = vld [vmem:[#allocation7 + $0x220] sm:$0xff]  ;;  %v2307_v52 = vld [vmem:[#allocation7 + $0x258] sm:$0xff] }
 0x368   : > { %3101 = vmatprep.subr.bf16.mxu1 %v4623_v11  ;;  %v2314_v46 = vld [vmem:[#allocation7 + $0x290] sm:$0xff]  ;;  %v2317_v47 = vld [vmem:[#allocation7 + $0x2a8] sm:$0xff] }
 0x36a   : > { %2139 = vmatpush1.msra.mxu0 %v1983_v59  ;;  %v4683_v59 = vpack.c.bf16 %v2286_v25, %v2284_v45  ;;  %v2302_v45 = vld [vmem:[#allocation7 + $0x230] sm:$0xff]  ;;  %v2305_v25 = vld [vmem:[#allocation7 + $0x248] sm:$0xff] }
 0x36b   : > { %2985 = vmatmul.mubr.msk.f32.vlgmr.msra.gmra.mrb[10].mxu0 %vm513_vm3, %v4494_v33  ;;  %3103 = vmatpush1.bf16.msra.mxu1 %v4629_v44  ;;  %v4650_v33 = vpack.c.bf16 %v2267_v51, %v2265_v16  ;;  %v2293_v16 = vld [vmem:[#allocation7 + $0x1e8] sm:$0xff]  ;;  %v2295_v51 = vld [vmem:[#allocation7 + $0x1f8] sm:$0xff]  ;;  %v3150_v56 = vpack.c.bf16 %v2302_v45, %v2300_v21  ;;  %v3152_v62 = vpack.c.bf16 %v2307_v52, %v2305_v25  ;;  %v2316_v45 = vld [vmem:[#allocation7 + $0x2a0] sm:$0xff] }
 0x36c   : > { %3105 = vmatprep.subr.bf16.mxu1 %v4632_v26  ;;  %2998 = vmatprep.subr.mxu0 %v4865_v8  ;;  %v4693_v19 = vpack.c.bf16 %v2295_v51, %v2293_v16  ;;  %v2306_v16 = vld [vmem:[#allocation7 + $0x250] sm:$0xff]  ;;  %v2309_v51 = vld [vmem:[#allocation7 + $0x268] sm:$0xff] }
 0x36d   : > { %v3154_v23 = vpack.c.bf16 %v2306_v16, %v2304_v3  ;;  %v3156_v29 = vpack.c.bf16 %v2311_v20, %v2309_v51  ;;  %v2318_v25 = vld [vmem:[#allocation7 + $0x2b0] sm:$0xff]  ;;  %v2321_v52 = vld [vmem:[#allocation7 + $0x2c8] sm:$0xff]  ;;  %v2323_v3 = vld [vmem:[#allocation7 + $0x2d8] sm:$0xff]  ;;  %v3278_v16 = vadd.f32 %v4589_v30, %v4231_v36 }
 0x36e   : > { %v3166_v51 = vpack.c.bf16 %v2318_v25, %v2316_v45  ;;  %v2324_v36 = vld [vmem:[#allocation7 + $0x2e0] sm:$0xff]  ;;  %v2326_v45 = vld [vmem:[#allocation7 + $0x2f0] sm:$0xff] }
 0x36f   : > { %3107 = vmatpush1.bf16.msra.mxu1 %v4640_v31  ;;  %v3174_v25 = vpack.c.bf16 %v2326_v45, %v2324_v36 }
 0x370   : > { %3109 = vmatprep.subr.bf16.mxu1 %v4643_v61 }
 0x373   : > { %3111 = vmatpush1.bf16.msra.mxu1 %v4647_v18 }
 0x374   : > { %3113 = vmatprep.subr.bf16.mxu1 %v4650_v33 }
 0x377   : > { %3115 = vmatpush1.bf16.msra.mxu1 %v4653_v50 }
 0x378   : > { %3117 = vmatprep.subr.bf16.mxu1 %v4656_v24 }
 0x37b   : > { %3119 = vmatpush1.bf16.msra.mxu1 %v4659_v1 }
 0x37c   : > { %3121 = vmatprep.subr.bf16.mxu1 %v4662_v40 }
 0x37f   : > { %3123 = vmatpush1.bf16.msra.mxu1 %v4665_v57 }
 0x380   : > { %3125 = vmatprep.subr.bf16.mxu1 %v4668_v60 }
 0x383   : > { %3127 = vmatpush1.bf16.msra.mxu1 %v4671_v13 }
 0x384   : > { %3129 = vmatprep.subr.bf16.mxu1 %v4674_v5 }
 0x387   : > { %3131 = vmatpush1.bf16.msra.mxu1 %v4677_v53 }
 0x388   : > { %3133 = vmatprep.subr.bf16.mxu1 %v4680_v55 }
 0x38b   : > { %3135 = vmatpush1.bf16.msra.mxu1 %v4683_v59 }
 0x38c   : > { %3137 = vmatprep.subr.bf16.mxu1 %v4686_v54 }
 0x38f   : > { %3139 = vmatpush1.bf16.msra.mxu1 %v4689_v17 }
 0x390   : > { %3141 = vmatprep.subr.bf16.mxu1 %v4693_v19 }
 0x393   : > { %3143 = vmatpush1.bf16.msra.mxu1 %v4695_v49 }
 0x394   : > { %3145 = vmatprep.subr.bf16.mxu1 %v4699_v2 }
 0x410   : > { %v2058_v4 = vpop.f32.mrb[2].mxu0 }
 0x411   : > { %v3272_v42 = vadd.f32 %v2058_v4, %v4589_v30  ;;  %v2060_v43 = vpop.f32.mrb[3].mxu0  ;;  %v2310_v4 = vld [vmem:[#allocation7 + $0x270] sm:$0xff] }
 0x412   : > { %v3274_v15 = vadd.f32 %v2060_v43, %v4589_v30  ;;  %v2315_v43 = vld [vmem:[#allocation7 + $0x298] sm:$0xff]  ;;  %v3158_v7 = vpack.c.bf16 %v2310_v4, %v2308_v0  ;;  %v3281_v0 = vadd.f32 %v4589_v30, %v4233_v37  ;;  %v3168_v4 = vpack.c.bf16 %v2323_v3, %v2321_v52 }
 0x413   : > { %v3273_v35 = vadd.f32 %v3272_v42, %v4597_v41  ;;  %v2313_v42 = vld [vmem:[#allocation7 + $0x288] sm:$0xff]  ;;  %v4885_v52 = vmov 0.0  }
 0x414   : > { %v3275_v34 = vadd.f32 %v3274_v15, %v4597_v41  ;;  %v3160_v58 = vpack.c.bf16 %v2315_v43, %v2313_v42  ;;  %v2312_v15 = vld [vmem:[#allocation7 + $0x280] sm:$0xff]  ;;  %v2322_v43 = vld [vmem:[#allocation7 + $0x2d0] sm:$0xff]  ;;  %3000 = vmatprep.mubr.msk.f32.mxu0 %vm3737_vm10, %v4885_v52 }
 0x415   : > { %v2320_v42 = vld [vmem:[#allocation7 + $0x2c0] sm:$0xff] }
 0x416   : > { %2392 = vmatprep.mubr.f32.mxu1 %v3275_v34  ;;  %v2319_v34 = vld [vmem:[#allocation7 + $0x2b8] sm:$0xff] }
 0x417   : > { %2393 = vmatmul.mubr.f32.vlgmr.msra.gmra.mrb[4].mxu1 %v3273_v35  ;;  %v3162_v35 = vpack.c.bf16 %v2314_v46, %v2312_v15  ;;  %v3164_v21 = vpack.c.bf16 %v2319_v34, %v2317_v47  ;;  %v2325_v47 = vld [vmem:[#allocation7 + $0x2e8] sm:$0xff]  ;;  %v2327_v34 = vld [vmem:[#allocation7 + $0x2f8] sm:$0xff] }
 0x418   : > { %3147 = vmatpush1.bf16.msra.mxu1 %v4705_v32  ;;  %2463 = vmatprep.mubr.f32.mxu1 %v4865_v8  ;;  %v3170_v8 = vpack.c.bf16 %v2322_v43, %v2320_v42  ;;  %v3172_v49 = vpack.c.bf16 %v2327_v34, %v2325_v47 }
 0x419   : > { %3149 = vmatprep.subr.bf16.mxu1 %v4708_v48 }
 0x41c   : > { %3151 = vmatpush1.bf16.msra.mxu1 %v3150_v56 }
 0x41d   : > { %3153 = vmatprep.subr.bf16.mxu1 %v3152_v62 }
 0x420   : > { %3155 = vmatpush1.bf16.msra.mxu1 %v3154_v23 }
 0x421   : > { %3157 = vmatprep.subr.bf16.mxu1 %v3156_v29 }
 0x424   : > { %3159 = vmatpush1.bf16.msra.mxu1 %v3158_v7 }
 0x425   : > { %3161 = vmatprep.subr.bf16.mxu1 %v3160_v58 }
 0x428   : > { %3163 = vmatpush1.bf16.msra.mxu1 %v3162_v35 }
 0x429   : > { %v2129_v20 = vpop.f32.mrb[2].mxu1  ;;  %3165 = vmatprep.subr.bf16.mxu1 %v3164_v21 }
 0x42a   : > { %v3279_v15 = vadd.f32 %v3278_v16, %v2129_v20  ;;  %v2131_v46 = vpop.f32.mrb[3].mxu1 }
 0x42b   : > { %v4717_v12 = vadd.f32 %v3281_v0, %v2131_v46 }
 0x42c   : > { %3167 = vmatpush1.bf16.msra.mxu1 %v3166_v51  ;;  %v3280_v37 = vadd.f32 %v3279_v15, %v4597_v41 }
 0x42d   : > { %3169 = vmatprep.subr.bf16.mxu1 %v3168_v4 }
 0x430   : > { %3171 = vmatpush1.bf16.msra.mxu1 %v3170_v8 }
 0x431   : > { %3173 = vmatprep.subr.bf16.mxu1 %v3172_v49 }
 0x434   : > { %3175 = vmatpush1.bf16.msra.mxu1 %v3174_v25 }
 0x435   : > { %3241 = vmatprep.subr.bf16.mxu1 %v4699_v2 }
 0x437   : > { %2464 = vmatmul.mubr.f32.vlgmr.msra.gmra.mrb[4].mxu1 %v3280_v37 }
 0x438   : > { %3243 = vmatpush1.bf16.msra.mxu1 %v4705_v32  ;;  %2726 = vmatprep.mubr.f32.mxu1 %v4885_v52 }
 0x439   : > { %3245 = vmatprep.subr.bf16.mxu1 %v4708_v48 }
 0x43c   : > { %3247 = vmatpush1.bf16.msra.mxu1 %v3150_v56 }
 0x43d   : > { %3249 = vmatprep.subr.bf16.mxu1 %v3152_v62 }
 0x43e   : > { %v2200_v3 = vpop.f32.mrb[10].mxu0 }
 0x43f   : > { %v2202_v16 = vpop.f32.mrb[11].mxu0 }
 0x440   : > { %3251 = vmatpush1.bf16.msra.mxu1 %v3154_v23  ;;  %v3286_v2 = vadd.f32 %v2202_v16, %v4589_v30 }
 0x441   : > { %3253 = vmatprep.subr.bf16.mxu1 %v3156_v29 }
 0x442   : > { %v3287_v32 = vadd.f32 %v3286_v2, %v4597_v41 }
 0x444   : > { %3255 = vmatpush1.bf16.msra.mxu1 %v3158_v7 }
 0x445   : > { %3257 = vmatprep.subr.bf16.mxu1 %v3160_v58  ;;  %v3284_v58 = vadd.f32 %v2200_v3, %v4589_v30 }
 0x447   : > { %v3285_v0 = vadd.f32 %v3284_v58, %v4597_v41 }
 0x448   : > { %3259 = vmatpush1.bf16.msra.mxu1 %v3162_v35 }
 0x449   : > { %3261 = vmatprep.subr.bf16.mxu1 %v3164_v21 }
 0x44c   : > { %3263 = vmatpush1.bf16.msra.mxu1 %v3166_v51  ;;  %v4742_v51 = vld [vmem:[%s4854_s7] sm:$0xff] }
 0x44d   : > { %3265 = vmatprep.subr.bf16.mxu1 %v3168_v4 }
 0x450   : > { %3267 = vmatpush1.bf16.msra.mxu1 %v3170_v8 }
 0x451   : > { %3269 = vmatprep.subr.bf16.mxu1 %v3172_v49 }
 0x454   : > { %3271 = vmatpush1.bf16.msra.mxu1 %v3174_v25 }
 0x457   : > { %2727 = vmatmul.mubr.f32.vlgmr.msra.gmra.mrb[6].mxu1 %v3287_v32 }
 0x50a   : > { %v4726_v48 = vpop.f32.mrb[4].mxu1 }
 0x50b   : > { %v4728_v56 = vpop.f32.mrb[5].mxu1  ;;  %v2473_v62 = vmul.f32 %v4726_v48, %v4726_v48 }
 0x50c   : > { %v2470_v23 = vadd.f32 %v4728_v56, %v4726_v48  ;;  %v2474_v8 = vmul.f32 %v4728_v56, %v4728_v56 }
 0x50e   : > { %2471 = vadd.xlane.f32.xlu0 %v2470_v23  ;;  %v2475_v29 = vadd.f32 %v2474_v8, %v2473_v62 }
 0x510   : > { %2476 = vadd.xlane.f32.xlu1 %v2475_v29 }
 0x52a   : > { %v2728_v49 = vpop.f32.mrb[6].mxu1 }
 0x52b   : > { %v2730_v7 = vpop.f32.mrb[7].mxu1 }
 0x59b   : > { %v2472_v35 = vpop.xlane.xlu0 %2471 }
 0x59d   : > { %v2477_v21 = vpop.xlane.xlu1 %2476 }
 0x59e   : > { %v2479_v20 = vsel %vm2478_vm11, %v2472_v35, %v2477_v21 }
 0x59f   : > { %2999 = vmatpush3.msra.mxu0 %v2479_v20 }
 0x5a0   : > { %3001 = vmatmul.mubr.msk.f32.vlgmr.msra.gmra.mrb[12].mxu0 %vm2480_vm12, %v4742_v51  ;;  %3177 = vmatprep.subr.bf16.mxu0 %v4571_v63  ;;  %v4886_v63 = vld [vmem:[#allocation14_spill] sm:$0xff] }
 0x5a1   : > { %3179 = vmatpush1.bf16.msra.mxu0 %v4576_v9  ;;  %2655 = vmatprep.mubr.f32.mxu0 %v3285_v0  ;;  %v3283_v9 = vadd.f32 %v4717_v12, %v4597_v41 }
 0x5a2   : > { %3181 = vmatprep.subr.bf16.mxu0 %v4579_v22 }
 0x5a5   : > { %3183 = vmatpush1.bf16.msra.mxu0 %v4584_v27 }
 0x5a6   : > { %3185 = vmatprep.subr.bf16.mxu0 %v4587_v28 }
 0x5a9   : > { %3187 = vmatpush1.bf16.msra.mxu0 %v4592_v38 }
 0x5aa   : > { %3189 = vmatprep.subr.bf16.mxu0 %v4595_v39 }
 0x5ad   : > { %3191 = vmatpush1.bf16.msra.mxu0 %v4600_v14 }
 0x5ae   : > { %3193 = vmatprep.subr.bf16.mxu0 %v4603_v10 }
 0x5b1   : > { %3195 = vmatpush1.bf16.msra.mxu0 %v4620_v6 }
 0x5b2   : > { %3197 = vmatprep.subr.bf16.mxu0 %v4623_v11 }
 0x5b5   : > { %3199 = vmatpush1.bf16.msra.mxu0 %v4629_v44 }
 0x5b6   : > { %3201 = vmatprep.subr.bf16.mxu0 %v4632_v26 }
 0x5b9   : > { %3203 = vmatpush1.bf16.msra.mxu0 %v4640_v31 }
 0x5ba   : > { %3205 = vmatprep.subr.bf16.mxu0 %v4643_v61  ;;  %v3739_v61 = vmov 1  }
 0x5bb   : > { %3540 = vset.pattern.permute.xlu0 %v3739_v61 }
 0x5bd   : > { %3207 = vmatpush1.bf16.msra.mxu0 %v4647_v18 }
 0x5be   : > { %3209 = vmatprep.subr.bf16.mxu0 %v4650_v33 }
 0x5c1   : > { %3211 = vmatpush1.bf16.msra.mxu0 %v4653_v50 }
 0x5c2   : > { %3213 = vmatprep.subr.bf16.mxu0 %v4656_v24 }
 0x5c5   : > { %3215 = vmatpush1.bf16.msra.mxu0 %v4659_v1 }
 0x5c6   : > { %3217 = vmatprep.subr.bf16.mxu0 %v4662_v40 }
 0x5c9   : > { %3219 = vmatpush1.bf16.msra.mxu0 %v4665_v57 }
 0x5ca   : > { %3221 = vmatprep.subr.bf16.mxu0 %v4668_v60 }
 0x5cd   : > { %3223 = vmatpush1.bf16.msra.mxu0 %v4671_v13  ;;  %v2231_v13 = vld [vmem:[%s4853_s6] sm:$0xff] }
 0x5ce   : > { %3225 = vmatprep.subr.bf16.mxu0 %v4674_v5  ;;  %v4887_v5 = vmov 0  }
 0x5d1   : > { %3227 = vmatpush1.bf16.msra.mxu0 %v4677_v53 }
 0x5d2   : > { %3229 = vmatprep.subr.bf16.mxu0 %v4680_v55 }
 0x5d5   : > { %3231 = vmatpush1.bf16.msra.mxu0 %v4683_v59 }
 0x5d6   : > { %3233 = vmatprep.subr.bf16.mxu0 %v4686_v54 }
 0x5d9   : > { %3235 = vmatpush1.bf16.msra.mxu0 %v4689_v17  ;;  %v2230_v17 = vld [vmem:[%s4852_s5] sm:$0xff] }
 0x5da   : > { %3237 = vmatprep.subr.bf16.mxu0 %v4693_v19 }
 0x5dd   : > { %3239 = vmatpush1.bf16.msra.mxu0 %v4886_v63 }
 0x5de   : > { %3003 = vmatprep.subr.mxu0 %v4885_v52 }
 0x5e0   : > { %2656 = vmatmul.mubr.f32.vlgmr.msra.gmra.mrb[14].mxu0 %v3283_v9 }
 0x5e1   : > { %3005 = vmatprep.mubr.msk.f32.mxu0 %vm3737_vm10, %v4885_v52 }
 0x673   : > { %v2550_v22 = vpop.f32.mrb[12].mxu0 }
 0x674   : > { %v2554_v27 = vmul.f32 0.001953125, %v2550_v22  ;;  %v3002_v28 = vpop.f32.mrb[13].mxu0 }
 0x676   : > { %v2555_v30 = vmul.f32 %v2554_v27, %v2554_v27 }
 0x678   : > { %2557 = vrot.lane.b32.xlu1 %v2555_v30, %s3738_s30 }
 0x67c   : > { %2563 = vperm.xlu1 %3539, %v2554_v27  }
 0x6b3   : > { %v2657_v38 = vpop.f32.mrb[14].mxu0 }
 0x6b4   : > { %v2729_v39 = vadd.f32 %v2728_v49, %v2657_v38  ;;  %v2659_v14 = vpop.f32.mrb[15].mxu0 }
 0x6b5   : > { %v2731_v10 = vadd.f32 %v2730_v7, %v2659_v14 }
 0x6b6   : > { %v2736_v11 = vmul.f32 %v2729_v39, %v2729_v39 }
 0x6b7   : > { %v2733_v6 = vadd.f32 %v2731_v10, %v2729_v39  ;;  %v2737_v12 = vmul.f32 %v2731_v10, %v2731_v10 }
 0x6b9   : > { %2734 = vadd.xlane.f32.xlu0 %v2733_v6  ;;  %v2738_v41 = vadd.f32 %v2737_v12, %v2736_v11 }
 0x6bd   : > { %2739 = vadd.xlane.f32.xlu0 %v2738_v41 }
 0x6ea   : > { %v2558_v18 = vpop.permute.xlu1 %2557 }
 0x6eb   : > { %v2560_v33 = vsub.f32 %v2554_v27, %v2558_v18 }
 0x6ed   : > { %v2568_v50 = vadd.f32 1e-05, %v2560_v33 }
 0x6ef   : > { %3557 = vrsqrt.f32 %v2568_v50 }
 0x6f9   : > { %v3558_v60 = vpop.eup %3557 }
 0x6fb   : > { %v2564_v19 = vpop.permute.xlu1 %2563 }
 0x6fc   : > { %v2566_v15 = vsub.f32 %v4726_v48, %v2564_v19  ;;  %v2567_v46 = vsub.f32 %v4728_v56, %v2564_v19 }
 0x746   : > { %v2735_v44 = vpop.xlane.xlu0 %2734 }
 0x74a   : > { %v2740_v26 = vpop.xlane.xlu0 %2739 }
 0x74b   : > { %v2741_v31 = vsel %vm2478_vm11, %v2735_v44, %v2740_v26 }
 0x74c   : > { %3004 = vmatpush3.msra.mxu0 %v2741_v31 }
 0x74d   : > { %3006 = vmatmul.mubr.msk.f32.vlgmr.msra.gmra.mrb[16].mxu0 %vm2480_vm12, %v4742_v51 }
 0x820   : > { %v2808_v24 = vpop.f32.mrb[16].mxu0 }
 0x821   : > { %v2812_v1 = vmul.f32 0.001953125, %v2808_v24  ;;  %v3007_v40 = vpop.f32.mrb[17].mxu0 }
 0x823   : > { %2821 = vperm.xlu1 %3539, %v2812_v1   ;;  %v2813_v57 = vmul.f32 %v2812_v1, %v2812_v1 }
 0x825   : > { %2815 = vrot.lane.b32.xlu0 %v2813_v57, %s3738_s30  ;;  %s3651_s30 = sshll.u32 %s3740_s1, 4  ;;  %s3652_s30 = int_to_ptr.vmem [resolvable:$false] %s3651_s30 }
 0x826   : > { %s3653_s23 = scalar_lea.vmem %s3652_s30, 1024  ;;  %p3654_p5 = scmp.lt.s32.totalorder %s4805_s29, %s3652_s30 }
 0x827   : > { %3541 = vset.pattern.permute.xlu1 %v3739_v61  ;;  %p3655_p9 = scmp.lt.s32.totalorder %s3653_s23, %s3647_s25 }
 0x829   : > { %2572 = vperm.xlu0 %3540, %v3558_v60   ;;  %p3656_p12 = por %p3655_p9, %p3654_p5 }
 0x82b   : > { %p3657_p2 = pnand %p3656_p12, %p3650_p3 }
 0x82d   : > { %3543 = vset.pattern.permute.xlu0 %v4887_v5 }
 0x82e   : > { %2586 = vperm.xlu0 %3543, %v2231_v13  }
 0x832   : > { %3544 = vset.pattern.permute.xlu0 %v3739_v61 }
 0x897   : > { %v2816_v53 = vpop.permute.xlu0 %2815 }
 0x898   : > { %v2818_v55 = vsub.f32 %v2812_v1, %v2816_v53 }
 0x89a   : > { %v2826_v59 = vadd.f32 1e-05, %v2818_v55 }
 0x89c   : > { %3559 = vrsqrt.f32 %v2826_v59 }
 0x8a2   : > { %v2822_v4 = vpop.permute.xlu1 %2821 }
 0x8a3   : > { %v2824_v47 = vsub.f32 %v2729_v39, %v2822_v4  ;;  %v2825_v34 = vsub.f32 %v2731_v10, %v2822_v4 }
 0x8a6   : > { %v3560_v54 = vpop.eup %3559 }
 0x8a7   : > { %2830 = vperm.xlu1 %3541, %v3560_v54  }
 0x8a8   : > { %v2573_v43 = vpop.permute.xlu0 %2572 }
 0x8a9   : > { %v2575_v36 = vmul.f32 %v2573_v43, %v2566_v15  ;;  %v2576_v45 = vmul.f32 %v2573_v43, %v2567_v46 }
 0x8ab   : > { %3542 = vset.pattern.permute.xlu1 %v4887_v5 }
 0x8ac   : > { %2579 = vperm.xlu1 %3542, %v2230_v17  }
 0x8ad   : > { %v2587_v3 = vpop.permute.xlu0 %2586 }
 0x926   : > { %v2831_v42 = vpop.permute.xlu1 %2830 }
 0x927   : > { %v2833_v25 = vmul.f32 %v2831_v42, %v2824_v47  ;;  %v2834_v37 = vmul.f32 %v2831_v42, %v2825_v34 }
 0x92b   : > { %v2580_v52 = vpop.permute.xlu1 %2579 }
 0x92c   : > { %v2582_v16 = vmul.f32 %v2580_v52, %v2575_v36  ;;  %v2583_v2 = vmul.f32 %v2580_v52, %v2576_v45  ;;  %v2835_v32 = vmul.f32 %v2833_v25, %v2580_v52  ;;  %v2836_v62 = vmul.f32 %v2834_v37, %v2580_v52 }
 0x92e   : > { %v2589_v48 = vadd.f32 %v2587_v3, %v2582_v16  ;;  %v2590_v23 = vadd.f32 %v2587_v3, %v2583_v2  ;;  %v2837_v56 = vadd.f32 %v2835_v32, %v2587_v3  ;;  %v2838_v8 = vadd.f32 %v2836_v62, %v2587_v3 }
 0x930   : > { %2839 = vst [vmem:[%s404_s27] sm:$0xff] %v2589_v48  ;;  %2840 = vst [vmem:[%s404_s27 + $0x8] sm:$0xff] %v2590_v23 }
 0x931   : > { %2841 = vst [vmem:[%s404_s27 + $0x10] sm:$0xff] %v2837_v56  ;;  %2842 = vst [vmem:[%s404_s27 + $0x18] sm:$0xff] %v2838_v8 }
 0x932   : > { %3660 = shalt.err (!%p3657_p2)
}
 0x933   : > { %s3661_s9 = scalar_lea.hbm %s4803_s18, 512  ;;  %s3665_s21 = scalar_lea.hbm %s4857_s10, 1024 }
 0x934   : > { %p3662_p13 = scmp.ne.s32.totalorder %s4803_s18, %s3661_s9  ;;  %p3666_p4 = scmp.lt.u32.totalorder %s4803_s18, %s4857_s10 }
 0x935   : > { %p3667_p7 = scmp.lt.u32.totalorder %s3665_s21, %s3661_s9  ;;  %p3669_p8 = scmp.lt.u32.totalorder %s3661_s9, %s4803_s18 }
 0x936   : > { %p3663_p6 = pnand %p3662_p13, %p4888_p0 }
 0x937   : > { %p3668_p11 = por %p3667_p7, %p3666_p4 }
 0x938   : > { %p3664_p10 = pneg %p3663_p6 }
 0x939   : > { %p3670_p1 = por %p3669_p8, %p3668_p11 }
 0x93b   : > { %p3671_p3 = pnand %p3670_p1, %p3664_p10 }
 0x93d   : > { %3674 = shalt.err (!%p3671_p3)
}
 0x93e   : > { %3343 = dma.vmem_to_hbm [thread:$0]  (%p4888_p0), %s4805_s29, 512, %s4803_s18, %s2844_s17  }
 0x93f PF: > { %s4889_s27 = sld [smem:[#allocation12_spill]]  ;;  %s4890_s13 = sld [smem:[#allocation13_spill]] }
 0x940   : > { %p4892_p9 = scmp.ge.s32.totalorder %s3717_s16, 2 }
 0x945   : > { %s2870_s24 = sand.u32 1, %s4889_s27   ;;  %p4891_p5 = scmp.ne.s32.totalorder %s4890_s13, 0 }
 0x946   : > { %s2871_s25 = scalar_lea.sflag [#allocation4], %s2870_s24 }
 0x947   : > { %p3357_p12 = pnand %p4892_p9, %p4891_p5 }
 0x949   : > { %3700 = dma.done.wait (!%p3357_p12), %s2871_s25, 512  }
 0x94a   : > { %3702 = vsyncadd (!%p3357_p12), %s2871_s25, 4294966784  ;;  %p24_p2 = scmp.ge.s32.totalorder %s3906_s28, 4   ;;  %s4893_s13 = smov %s3709_s14 }
 0x94b   : > { %s4894_s14 = smov %s3713_s15  ;;  %s4895_s15 = smov %s3915_s11 }
 0x94c   : > { %s4896_s16 = smov %s3906_s28  ;;  %26 = sbr.rel (!%p24_p2) target bundleno = 9 (0x9), region = 117 }
 0x953   :  { %2876 = vsyncpa [#allocation3], 1 }
 0x954   :  { %2878 = vsyncpa [#allocation3 + $0x1], 1 }
 0x955   :  { %2879 = vsyncpa [#allocation6], 1 }
 0x956   :  { %2880 = vsyncpa [#allocation4], 1 }
 0x957   :  { %2882 = vsyncpa [#allocation4 + $0x1], 1 }

</bundles_post_ra>
